<compile_context>
chip_gen: v7x
topology: tpu7x:2x2x1
jax: 0.10.0
libtpu: 0.0.40
codegen_flags: <defaults>
</compile_context>

<pallas_src>
import functools

import jax
import jax.numpy as jnp
from jax.experimental import pallas as pl
from jax.experimental.pallas import tpu as pltpu

_INV_SQRT2 = 0.7071067811865476
_LN_EPS = 1e-6  # DINOv2 uses nn.LayerNorm(eps=1e-6)


# ----------------------------------------------------------------------------
# Kernel
# ----------------------------------------------------------------------------
def _layer_norm(v, g, b):
  mu = jnp.mean(v, axis=-1, keepdims=True)
  var = jnp.mean((v - mu) ** 2, axis=-1, keepdims=True)
  return (v - mu) * jax.lax.rsqrt(var + _LN_EPS) * g + b


def backbone_kernel(patches_ref, patch_w, patch_b, cls_tok, pos_cls, pos_patch,
                    ln1_g, ln1_b, wqkv, bqkv, wo, bo, ls1,
                    ln2_g, ln2_b, fc1_w, fc1_b, fc2_w, fc2_b, ls2,
                    norm_g, norm_b,
                    normed_ref, tok,
                    *, num_heads, depth, n_last):
  """Grid = (batch, depth). One grid step applies one transformer block to one image.

  Tokens live in the `tok` VMEM scratch across the depth axis. At l == 0 the patch
  embedding (+cls +pos) is computed in-kernel; for the last `n_last` blocks the
  final backbone LayerNorm is fused as an epilogue and written to `normed_ref`.
  """
  l = pl.program_id(1)
  bf16 = jnp.bfloat16

  # ---- patch embed (conv-as-matmul) + cls insert + pos add, first step only ----
  @pl.when(l == 0)
  def _():
    p = patches_ref[0].astype(bf16)                              # [NP, C*P*P]
    pt = jnp.dot(p, patch_w[...], preferred_element_type=jnp.float32)
    pt = pt + patch_b[...] + pos_patch[...]                      # [NP, D] f32
    cls_row = cls_tok[...] + pos_cls[...]                        # [1, D]
    tok[...] = jnp.concatenate([cls_row, pt], axis=0)            # one aligned store

  x = tok[...]                                                   # [N, D] f32
  n_tok, dim = x.shape
  head_dim = dim // num_heads

  # ---- attention branch: fused QKV (scale pre-folded into q columns) ----
  xn = _layer_norm(x, ln1_g[0], ln1_b[0])
  qkv = jnp.dot(xn.astype(bf16), wqkv[0],
                preferred_element_type=jnp.float32) + bqkv[0]    # [N, 3D] f32

  ctx_parts = []
  for h in range(num_heads):                                     # static unroll
    q_h = qkv[:, h * head_dim:(h + 1) * head_dim]                # [N, Dh]
    k_h = qkv[:, dim + h * head_dim:dim + (h + 1) * head_dim]
    v_h = qkv[:, 2 * dim + h * head_dim:2 * dim + (h + 1) * head_dim]
    s = jax.lax.dot_general(q_h.astype(bf16), k_h.astype(bf16),
                            (((1,), (1,)), ((), ())),
                            preferred_element_type=jnp.float32)  # [N, N]
    s = s - jnp.max(s, axis=-1, keepdims=True)
    e = jnp.exp(s)
    denom = jnp.sum(e, axis=-1, keepdims=True)                   # [N, 1]
    ctx_h = jnp.dot(e.astype(bf16), v_h.astype(bf16),
                    preferred_element_type=jnp.float32)          # [N, Dh]
    # normalize after e@v: N*Dh elems instead of N*N; exact reciprocal on [N,1]
    ctx_parts.append(ctx_h * pl.reciprocal(denom))
  ctx = jnp.concatenate(ctx_parts, axis=-1)                      # [N, D] = [N, H*Dh]

  attn = jnp.dot(ctx.astype(bf16), wo[0],
                 preferred_element_type=jnp.float32) + bo[0]     # full-width matmul
  x = x + attn * ls1[0]                                          # LayerScale + residual

  # ---- MLP branch ----
  xn2 = _layer_norm(x, ln2_g[0], ln2_b[0])
  h1 = jnp.dot(xn2.astype(bf16), fc1_w[0],
               preferred_element_type=jnp.float32) + fc1_b[0]
  h1 = 0.5 * h1 * (1.0 + jax.lax.erf(h1 * _INV_SQRT2))           # exact GELU
  mlp = jnp.dot(h1.astype(bf16), fc2_w[0],
                preferred_element_type=jnp.float32) + fc2_b[0]
  x = x + mlp * ls2[0]

  tok[...] = x                                                   # stays resident in VMEM

  # ---- final backbone LayerNorm epilogue for collected (last n_last) blocks ----
  @pl.when(l >= depth - n_last)
  def _():
    normed_ref[0, 0] = _layer_norm(x, norm_g[...], norm_b[...])


# ----------------------------------------------------------------------------
# Wrapper (pallas_call glue)
# ----------------------------------------------------------------------------
def dinov2_forward(x_img, params, *, patch, num_heads, n_last_blocks=4):
  """Equivalent of DinoV2Sentinel2.forward: tuple of 4 (patch_tokens, class_token)."""
  bsz, chans, hh, ww = x_img.shape
  hp, wp = hh // patch, ww // patch
  np_ = hp * wp
  cpp = chans * patch * patch
  n_tok = np_ + 1
  dim = params["patch_w"].shape[1]
  depth = params["wqkv"].shape[0]
  n_last = n_last_blocks

  # im2col for the patchify conv (layout-only, done by XLA outside the kernel)
  patches = (x_img.reshape(bsz, chans, hp, patch, wp, patch)
             .transpose(0, 2, 4, 1, 3, 5)
             .reshape(bsz, np_, cpp))

  pe_consts = [params["patch_w"], params["patch_b"], params["cls_token"],
               params["pos_cls"], params["pos_patch"]]
  stacked = [params[k] for k in
             ("ln1_g", "ln1_b", "wqkv", "bqkv", "wo", "bo", "ls1",
              "ln2_g", "ln2_b", "fc1_w", "fc1_b", "fc2_w", "fc2_b", "ls2")]
  norm_consts = [params["norm_g"], params["norm_b"]]

  def const_spec(a):
    nd = a.ndim

    def imap(b, l):
      return (0,) * nd
    return pl.BlockSpec(a.shape, imap)

  def depth_spec(a):
    nd = a.ndim

    def imap(b, l):
      return (l,) + (0,) * (nd - 1)
    return pl.BlockSpec((1,) + a.shape[1:], imap)

  in_specs = ([pl.BlockSpec((1, np_, cpp), lambda b, l: (b, 0, 0))]
              + [const_spec(a) for a in pe_consts]
              + [depth_spec(a) for a in stacked]
              + [const_spec(a) for a in norm_consts])

  # Collected-layer output [n_last, B, N, D]: block index sticks at 0 until the
  # first collected block, then advances with l; written only under pl.when.
  out_specs = pl.BlockSpec(
      (1, 1, n_tok, dim),
      lambda b, l: (jnp.maximum(l - (depth - n_last), 0), b, 0, 0))

  # NOTE: the constant-index specs (patch embed, final norm) are DMA'd once; at
  # real ViT-B/L sizes also budget vmem_limit_bytes against the per-block weight
  # footprint (bf16 weights double-buffered) for v7x's 64 MiB VMEM.
  normed = pl.pallas_call(
      functools.partial(backbone_kernel, num_heads=num_heads,
                        depth=depth, n_last=n_last),
      out_shape=jax.ShapeDtypeStruct((n_last, bsz, n_tok, dim), jnp.float32),
      grid=(bsz, depth),
      in_specs=in_specs,
      out_specs=out_specs,
      scratch_shapes=[pltpu.VMEM((n_tok, dim), jnp.float32)],
      compiler_params=pltpu.CompilerParams(
          dimension_semantics=("parallel", "arbitrary"),
          vmem_limit_bytes=32 * 1024 * 1024),
  )(patches, *pe_consts, *stacked, *norm_consts)

  # (patch_tokens, class_token) per collected layer (cls token is row 0)
  return tuple((normed[i, :, 1:], normed[i, :, 0]) for i in range(n_last))


# ----------------------------------------------------------------------------
# Deterministic synthetic parameter init
# ----------------------------------------------------------------------------
def init_params(key, *, img_size, patch, in_chans, dim, depth, num_heads,
                mlp_ratio, nb_class):
  num_patches = (img_size // patch) ** 2
  head_dim = dim // num_heads
  hidden = dim * mlp_ratio
  scale = head_dim ** -0.5
  bf16 = jnp.bfloat16
  keys = jax.random.split(key, 9)

  def w(k, shape, std=0.02, dtype=jnp.float32):
    return (std * jax.random.normal(k, shape)).astype(dtype)

  # Fused qkv weight [depth, D, 3D]: columns ordered (q | k | v), head-major inside
  # each (matches torch qkv.weight.T reshaped as (3, H, Dh)); the attention scale
  # head_dim**-0.5 is folded into the q columns (and q bias) here, once, at init.
  qkv = w(keys[5], (depth, dim, 3 * dim))
  qkv = qkv.at[:, :, :dim].multiply(scale)
  bqkv = jnp.zeros((depth, 1, 3 * dim), jnp.float32)   # q part (zero) already scaled

  params = {
      "patch_w": w(keys[0], (in_chans * patch * patch, dim), dtype=bf16),
      "patch_b": jnp.zeros((1, dim), jnp.float32),
      "cls_token": w(keys[1], (1, dim)),
      "pos_cls": w(keys[2], (1, dim)),
      "pos_patch": w(keys[3], (num_patches, dim)),
      "norm_g": jnp.ones((1, dim), jnp.float32),
      "norm_b": jnp.zeros((1, dim), jnp.float32),
      # self.fc = nn.Linear(D, nb_class): present on the module, UNUSED by forward()
      "fc_w": w(keys[4], (dim, nb_class)),
      "fc_b": jnp.zeros((1, nb_class), jnp.float32),
      # depth-stacked block parameters (streamed along the depth grid axis)
      "ln1_g": jnp.ones((depth, 1, dim), jnp.float32),
      "ln1_b": jnp.zeros((depth, 1, dim), jnp.float32),
      "wqkv": qkv.astype(bf16),
      "bqkv": bqkv,
      "wo": w(keys[6], (depth, dim, dim), dtype=bf16),       # [in=H*Dh, out=D]
      "bo": jnp.zeros((depth, 1, dim), jnp.float32),
      "ls1": jnp.full((depth, 1, dim), 1e-5, jnp.float32),   # DINOv2 LayerScale init ~1e-5
      "ln2_g": jnp.ones((depth, 1, dim), jnp.float32),
      "ln2_b": jnp.zeros((depth, 1, dim), jnp.float32),
      "fc1_w": w(keys[7], (depth, dim, hidden), dtype=bf16),
      "fc1_b": jnp.zeros((depth, 1, hidden), jnp.float32),
      "fc2_w": w(keys[8], (depth, hidden, dim), dtype=bf16),
      "fc2_b": jnp.zeros((depth, 1, dim), jnp.float32),
      "ls2": jnp.full((depth, 1, dim), 1e-5, jnp.float32),
  }
  return params


# ----------------------------------------------------------------------------
# Main
# ----------------------------------------------------------------------------
if __name__ == "__main__":
  # Scaled-down DINOv2-style config (real dinov2_vits14: D=384, depth=12, H=6,
  # patch=14). D is a multiple of 128 (lane-dense stores), head_dim=64 as in DINOv2.
  B, C, IMG, PATCH = 2, 3, 56, 14
  DIM, DEPTH, HEADS, MLP_RATIO, NB_CLASS = 128, 6, 2, 4, 10
  NUM_PATCHES = (IMG // PATCH) ** 2

  key = jax.random.PRNGKey(0)
  pkey, xkey = jax.random.split(key)
  params = init_params(
      pkey, img_size=IMG, patch=PATCH, in_chans=C, dim=DIM, depth=DEPTH,
      num_heads=HEADS, mlp_ratio=MLP_RATIO, nb_class=NB_CLASS,
  )
  x = jax.random.normal(xkey, (B, C, IMG, IMG), dtype=jnp.float32)

  fwd = jax.jit(
      lambda inp: dinov2_forward(inp, params, patch=PATCH, num_heads=HEADS)
  )
  outputs = fwd(x)
  jax.block_until_ready(outputs)

  assert len(outputs) == 4
  for patch_tok, cls_tok in outputs:
    assert patch_tok.shape == (B, NUM_PATCHES, DIM), patch_tok.shape
    assert cls_tok.shape == (B, DIM), cls_tok.shape
    assert bool(jnp.all(jnp.isfinite(patch_tok)))
    assert bool(jnp.all(jnp.isfinite(cls_tok)))

  print("KERNEL_OK")
</pallas_src>

<mosaic_0001>
module attributes {stable_mosaic.version = 11 : i64} {
  func.func @backbone_kernel(%arg0: i32, %arg1: i32, %arg2: memref<1x16x588xf32, #tpu.memory_space<vmem>>, %arg3: memref<588x128xbf16, #tpu.memory_space<vmem>>, %arg4: memref<1x128xf32, #tpu.memory_space<vmem>>, %arg5: memref<1x128xf32, #tpu.memory_space<vmem>>, %arg6: memref<1x128xf32, #tpu.memory_space<vmem>>, %arg7: memref<16x128xf32, #tpu.memory_space<vmem>>, %arg8: memref<1x1x128xf32, #tpu.memory_space<vmem>>, %arg9: memref<1x1x128xf32, #tpu.memory_space<vmem>>, %arg10: memref<1x128x384xbf16, #tpu.memory_space<vmem>>, %arg11: memref<1x1x384xf32, #tpu.memory_space<vmem>>, %arg12: memref<1x128x128xbf16, #tpu.memory_space<vmem>>, %arg13: memref<1x1x128xf32, #tpu.memory_space<vmem>>, %arg14: memref<1x1x128xf32, #tpu.memory_space<vmem>>, %arg15: memref<1x1x128xf32, #tpu.memory_space<vmem>>, %arg16: memref<1x1x128xf32, #tpu.memory_space<vmem>>, %arg17: memref<1x128x512xbf16, #tpu.memory_space<vmem>>, %arg18: memref<1x1x512xf32, #tpu.memory_space<vmem>>, %arg19: memref<1x512x128xbf16, #tpu.memory_space<vmem>>, %arg20: memref<1x1x128xf32, #tpu.memory_space<vmem>>, %arg21: memref<1x1x128xf32, #tpu.memory_space<vmem>>, %arg22: memref<1x128xf32, #tpu.memory_space<vmem>>, %arg23: memref<1x128xf32, #tpu.memory_space<vmem>>, %arg24: memref<1x1x17x128xf32, #tpu.memory_space<vmem>>, %arg25: memref<17x128xf32, #tpu.memory_space<vmem>>) attributes {dimension_semantics = [#tpu.dimension_semantics<parallel>, #tpu.dimension_semantics<arbitrary>], iteration_bounds = array<i64: 2, 6>, scalar_prefetch = 0 : i64, scratch_operands = 1 : i64, tpu.core_type = #tpu.core_type<tc>, window_params = [{transform_indices = @transform_0, window_bounds = array<i64: 1, 16, 588>}, {pipeline_mode = #tpu.pipeline_mode<synchronous>, transform_indices = @transform_1, window_bounds = array<i64: 588, 128>}, {pipeline_mode = #tpu.pipeline_mode<synchronous>, transform_indices = @transform_2, window_bounds = array<i64: 1, 128>}, {pipeline_mode = #tpu.pipeline_mode<synchronous>, transform_indices = @transform_3, window_bounds = array<i64: 1, 128>}, {pipeline_mode = #tpu.pipeline_mode<synchronous>, transform_indices = @transform_4, window_bounds = array<i64: 1, 128>}, {pipeline_mode = #tpu.pipeline_mode<synchronous>, transform_indices = @transform_5, window_bounds = array<i64: 16, 128>}, {transform_indices = @transform_6, window_bounds = array<i64: 1, 1, 128>}, {transform_indices = @transform_7, window_bounds = array<i64: 1, 1, 128>}, {transform_indices = @transform_8, window_bounds = array<i64: 1, 128, 384>}, {transform_indices = @transform_9, window_bounds = array<i64: 1, 1, 384>}, {transform_indices = @transform_10, window_bounds = array<i64: 1, 128, 128>}, {transform_indices = @transform_11, window_bounds = array<i64: 1, 1, 128>}, {transform_indices = @transform_12, window_bounds = array<i64: 1, 1, 128>}, {transform_indices = @transform_13, window_bounds = array<i64: 1, 1, 128>}, {transform_indices = @transform_14, window_bounds = array<i64: 1, 1, 128>}, {transform_indices = @transform_15, window_bounds = array<i64: 1, 128, 512>}, {transform_indices = @transform_16, window_bounds = array<i64: 1, 1, 512>}, {transform_indices = @transform_17, window_bounds = array<i64: 1, 512, 128>}, {transform_indices = @transform_18, window_bounds = array<i64: 1, 1, 128>}, {transform_indices = @transform_19, window_bounds = array<i64: 1, 1, 128>}, {pipeline_mode = #tpu.pipeline_mode<synchronous>, transform_indices = @transform_20, window_bounds = array<i64: 1, 128>}, {pipeline_mode = #tpu.pipeline_mode<synchronous>, transform_indices = @transform_21, window_bounds = array<i64: 1, 128>}, {transform_indices = @transform_22, window_bounds = array<i64: 1, 1, 17, 128>}]} {
    %c0_i32 = arith.constant 0 : i32
    %0 = arith.cmpi eq, %arg1, %c0_i32 : i32
    %1 = arith.extui %0 : i1 to i32
    %c0_i32_0 = arith.constant 0 : i32
    %2 = arith.cmpi ne, %1, %c0_i32_0 : i32
    scf.if %2 {
      %c0_71 = arith.constant 0 : index
      %c0_72 = arith.constant 0 : index
      %c0_73 = arith.constant 0 : index
      %149 = vector.load %arg2[%c0_71, %c0_72, %c0_73] : memref<1x16x588xf32, #tpu.memory_space<vmem>>, vector<1x16x588xf32>
      %150 = vector.shape_cast %149 : vector<1x16x588xf32> to vector<16x588xf32>
      %151 = arith.truncf %150 : vector<16x588xf32> to vector<16x588xbf16>
      %c0_74 = arith.constant 0 : index
      %c0_75 = arith.constant 0 : index
      %152 = vector.load %arg3[%c0_74, %c0_75] : memref<588x128xbf16, #tpu.memory_space<vmem>>, vector<588x128xbf16>
      %cst_76 = arith.constant dense<0.000000e+00> : vector<16x128xf32>
      %153 = tpu.matmul %151, %152, %cst_76 {dimension_numbers = #tpu.dot_dimension_numbers<[1], [0], [0], [1], [0, 0, 1, 1], [], []>} : vector<16x588xbf16>, vector<588x128xbf16>, vector<16x128xf32> -> vector<16x128xf32>
      %c0_77 = arith.constant 0 : index
      %c0_78 = arith.constant 0 : index
      %154 = vector.load %arg4[%c0_77, %c0_78] : memref<1x128xf32, #tpu.memory_space<vmem>>, vector<1x128xf32>
      %155 = vector.broadcast %154 : vector<1x128xf32> to vector<16x128xf32>
      %156 = arith.addf %153, %155 : vector<16x128xf32>
      %c0_79 = arith.constant 0 : index
      %c0_80 = arith.constant 0 : index
      %157 = vector.load %arg7[%c0_79, %c0_80] : memref<16x128xf32, #tpu.memory_space<vmem>>, vector<16x128xf32>
      %158 = arith.addf %156, %157 : vector<16x128xf32>
      %c0_81 = arith.constant 0 : index
      %c0_82 = arith.constant 0 : index
      %159 = vector.load %arg5[%c0_81, %c0_82] : memref<1x128xf32, #tpu.memory_space<vmem>>, vector<1x128xf32>
      %c0_83 = arith.constant 0 : index
      %c0_84 = arith.constant 0 : index
      %160 = vector.load %arg6[%c0_83, %c0_84] : memref<1x128xf32, #tpu.memory_space<vmem>>, vector<1x128xf32>
      %161 = arith.addf %159, %160 : vector<1x128xf32>
      %162 = tpu.concatenate %161, %158 in 0 : vector<1x128xf32>, vector<16x128xf32> -> vector<17x128xf32>
      %c0_85 = arith.constant 0 : index
      %c0_86 = arith.constant 0 : index
      %163 = vector.load %arg25[%c0_85, %c0_86] : memref<17x128xf32, #tpu.memory_space<vmem>>, vector<17x128xf32>
      tpu.vector_store %arg25[%c0_85, %c0_86], %162 {strides = array<i32>} : memref<17x128xf32, #tpu.memory_space<vmem>>, vector<17x128xf32>,
    } else {
    }
    %c0 = arith.constant 0 : index
    %c0_1 = arith.constant 0 : index
    %3 = vector.load %arg25[%c0, %c0_1] : memref<17x128xf32, #tpu.memory_space<vmem>>, vector<17x128xf32>
    %c0_2 = arith.constant 0 : index
    %c0_3 = arith.constant 0 : index
    %c0_4 = arith.constant 0 : index
    %4 = vector.load %arg8[%c0_2, %c0_3, %c0_4] : memref<1x1x128xf32, #tpu.memory_space<vmem>>, vector<1x1x128xf32>
    %5 = vector.shape_cast %4 : vector<1x1x128xf32> to vector<1x128xf32>
    %c0_5 = arith.constant 0 : index
    %c0_6 = arith.constant 0 : index
    %c0_7 = arith.constant 0 : index
    %6 = vector.load %arg9[%c0_5, %c0_6, %c0_7] : memref<1x1x128xf32, #tpu.memory_space<vmem>>, vector<1x1x128xf32>
    %7 = vector.shape_cast %6 : vector<1x1x128xf32> to vector<1x128xf32>
    %cst = arith.constant dense<0.000000e+00> : vector<17xf32>
    %8 = vector.multi_reduction <add>, %3, %cst [1] : vector<17x128xf32> to vector<17xf32>
    %9 = vector.shape_cast %8 : vector<17xf32> to vector<17x1xf32>
    %cst_8 = arith.constant 1.280000e+02 : f32
    %10 = vector.broadcast %cst_8 : f32 to vector<17x1xf32>
    %11 = arith.divf %9, %10 : vector<17x1xf32>
    %12 = vector.broadcast %11 : vector<17x1xf32> to vector<17x128xf32>
    %13 = arith.subf %3, %12 : vector<17x128xf32>
    %14 = arith.mulf %13, %13 : vector<17x128xf32>
    %cst_9 = arith.constant dense<0.000000e+00> : vector<17xf32>
    %15 = vector.multi_reduction <add>, %14, %cst_9 [1] : vector<17x128xf32> to vector<17xf32>
    %16 = vector.shape_cast %15 : vector<17xf32> to vector<17x1xf32>
    %cst_10 = arith.constant 1.280000e+02 : f32
    %17 = vector.broadcast %cst_10 : f32 to vector<17x1xf32>
    %18 = arith.divf %16, %17 : vector<17x1xf32>
    %19 = vector.broadcast %11 : vector<17x1xf32> to vector<17x128xf32>
    %20 = arith.subf %3, %19 : vector<17x128xf32>
    %cst_11 = arith.constant 9.99999997E-7 : f32
    %21 = vector.broadcast %cst_11 : f32 to vector<17x1xf32>
    %22 = arith.addf %18, %21 : vector<17x1xf32>
    %23 = math.rsqrt %22 : vector<17x1xf32>
    %24 = vector.broadcast %23 : vector<17x1xf32> to vector<17x128xf32>
    %25 = arith.mulf %20, %24 : vector<17x128xf32>
    %26 = vector.broadcast %5 : vector<1x128xf32> to vector<17x128xf32>
    %27 = arith.mulf %25, %26 : vector<17x128xf32>
    %28 = vector.broadcast %7 : vector<1x128xf32> to vector<17x128xf32>
    %29 = arith.addf %27, %28 : vector<17x128xf32>
    %30 = arith.truncf %29 : vector<17x128xf32> to vector<17x128xbf16>
    %c0_12 = arith.constant 0 : index
    %c0_13 = arith.constant 0 : index
    %c0_14 = arith.constant 0 : index
    %31 = vector.load %arg10[%c0_12, %c0_13, %c0_14] : memref<1x128x384xbf16, #tpu.memory_space<vmem>>, vector<1x128x384xbf16>
    %32 = vector.shape_cast %31 : vector<1x128x384xbf16> to vector<128x384xbf16>
    %cst_15 = arith.constant dense<0.000000e+00> : vector<17x384xf32>
    %33 = tpu.matmul %30, %32, %cst_15 {dimension_numbers = #tpu.dot_dimension_numbers<[1], [0], [0], [1], [0, 0, 1, 1], [], []>} : vector<17x128xbf16>, vector<128x384xbf16>, vector<17x384xf32> -> vector<17x384xf32>
    %c0_16 = arith.constant 0 : index
    %c0_17 = arith.constant 0 : index
    %c0_18 = arith.constant 0 : index
    %34 = vector.load %arg11[%c0_16, %c0_17, %c0_18] : memref<1x1x384xf32, #tpu.memory_space<vmem>>, vector<1x1x384xf32>
    %35 = vector.shape_cast %34 : vector<1x1x384xf32> to vector<1x384xf32>
    %36 = vector.broadcast %35 : vector<1x384xf32> to vector<17x384xf32>
    %37 = arith.addf %33, %36 : vector<17x384xf32>
    %38 = vector.extract_strided_slice %37 {offsets = [0, 0], sizes = [17, 64], strides = [1, 1]} : vector<17x384xf32> to vector<17x64xf32>
    %39 = vector.extract_strided_slice %37 {offsets = [0, 128], sizes = [17, 64], strides = [1, 1]} : vector<17x384xf32> to vector<17x64xf32>
    %40 = vector.extract_strided_slice %37 {offsets = [0, 256], sizes = [17, 64], strides = [1, 1]} : vector<17x384xf32> to vector<17x64xf32>
    %41 = arith.truncf %38 : vector<17x64xf32> to vector<17x64xbf16>
    %42 = arith.truncf %39 : vector<17x64xf32> to vector<17x64xbf16>
    %cst_19 = arith.constant dense<0.000000e+00> : vector<17x17xf32>
    %43 = tpu.matmul %41, %42, %cst_19 {dimension_numbers = #tpu.dot_dimension_numbers<[1], [1], [0], [0], [0, 0, 1, 0], [], []>} : vector<17x64xbf16>, vector<17x64xbf16>, vector<17x17xf32> -> vector<17x17xf32>
    %cst_20 = arith.constant dense<0xFF800000> : vector<17xf32>
    %44 = vector.multi_reduction <maximumf>, %43, %cst_20 [1] : vector<17x17xf32> to vector<17xf32>
    %45 = vector.shape_cast %44 : vector<17xf32> to vector<17x1xf32>
    %46 = vector.broadcast %45 : vector<17x1xf32> to vector<17x17xf32>
    %47 = arith.subf %43, %46 : vector<17x17xf32>
    %48 = math.exp %47 : vector<17x17xf32>
    %cst_21 = arith.constant dense<0.000000e+00> : vector<17xf32>
    %49 = vector.multi_reduction <add>, %48, %cst_21 [1] : vector<17x17xf32> to vector<17xf32>
    %50 = vector.shape_cast %49 : vector<17xf32> to vector<17x1xf32>
    %51 = arith.truncf %48 : vector<17x17xf32> to vector<17x17xbf16>
    %52 = arith.truncf %40 : vector<17x64xf32> to vector<17x64xbf16>
    %cst_22 = arith.constant dense<0.000000e+00> : vector<17x64xf32>
    %53 = tpu.matmul %51, %52, %cst_22 {dimension_numbers = #tpu.dot_dimension_numbers<[1], [0], [0], [1], [0, 0, 1, 1], [], []>} : vector<17x17xbf16>, vector<17x64xbf16>, vector<17x64xf32> -> vector<17x64xf32>
    %54 = tpu.reciprocal %50 : vector<17x1xf32> -> vector<17x1xf32>
    %55 = vector.broadcast %54 : vector<17x1xf32> to vector<17x64xf32>
    %56 = arith.mulf %53, %55 : vector<17x64xf32>
    %57 = vector.extract_strided_slice %37 {offsets = [0, 64], sizes = [17, 64], strides = [1, 1]} : vector<17x384xf32> to vector<17x64xf32>
    %58 = vector.extract_strided_slice %37 {offsets = [0, 192], sizes = [17, 64], strides = [1, 1]} : vector<17x384xf32> to vector<17x64xf32>
    %59 = vector.extract_strided_slice %37 {offsets = [0, 320], sizes = [17, 64], strides = [1, 1]} : vector<17x384xf32> to vector<17x64xf32>
    %60 = arith.truncf %57 : vector<17x64xf32> to vector<17x64xbf16>
    %61 = arith.truncf %58 : vector<17x64xf32> to vector<17x64xbf16>
    %cst_23 = arith.constant dense<0.000000e+00> : vector<17x17xf32>
    %62 = tpu.matmul %60, %61, %cst_23 {dimension_numbers = #tpu.dot_dimension_numbers<[1], [1], [0], [0], [0, 0, 1, 0], [], []>} : vector<17x64xbf16>, vector<17x64xbf16>, vector<17x17xf32> -> vector<17x17xf32>
    %cst_24 = arith.constant dense<0xFF800000> : vector<17xf32>
    %63 = vector.multi_reduction <maximumf>, %62, %cst_24 [1] : vector<17x17xf32> to vector<17xf32>
    %64 = vector.shape_cast %63 : vector<17xf32> to vector<17x1xf32>
    %65 = vector.broadcast %64 : vector<17x1xf32> to vector<17x17xf32>
    %66 = arith.subf %62, %65 : vector<17x17xf32>
    %67 = math.exp %66 : vector<17x17xf32>
    %cst_25 = arith.constant dense<0.000000e+00> : vector<17xf32>
    %68 = vector.multi_reduction <add>, %67, %cst_25 [1] : vector<17x17xf32> to vector<17xf32>
    %69 = vector.shape_cast %68 : vector<17xf32> to vector<17x1xf32>
    %70 = arith.truncf %67 : vector<17x17xf32> to vector<17x17xbf16>
    %71 = arith.truncf %59 : vector<17x64xf32> to vector<17x64xbf16>
    %cst_26 = arith.constant dense<0.000000e+00> : vector<17x64xf32>
    %72 = tpu.matmul %70, %71, %cst_26 {dimension_numbers = #tpu.dot_dimension_numbers<[1], [0], [0], [1], [0, 0, 1, 1], [], []>} : vector<17x17xbf16>, vector<17x64xbf16>, vector<17x64xf32> -> vector<17x64xf32>
    %73 = tpu.reciprocal %69 : vector<17x1xf32> -> vector<17x1xf32>
    %74 = vector.broadcast %73 : vector<17x1xf32> to vector<17x64xf32>
    %75 = arith.mulf %72, %74 : vector<17x64xf32>
    %76 = tpu.concatenate %56, %75 in 1 : vector<17x64xf32>, vector<17x64xf32> -> vector<17x128xf32>
    %77 = arith.truncf %76 : vector<17x128xf32> to vector<17x128xbf16>
    %c0_27 = arith.constant 0 : index
    %c0_28 = arith.constant 0 : index
    %c0_29 = arith.constant 0 : index
    %78 = vector.load %arg12[%c0_27, %c0_28, %c0_29] : memref<1x128x128xbf16, #tpu.memory_space<vmem>>, vector<1x128x128xbf16>
    %79 = vector.shape_cast %78 : vector<1x128x128xbf16> to vector<128x128xbf16>
    %cst_30 = arith.constant dense<0.000000e+00> : vector<17x128xf32>
    %80 = tpu.matmul %77, %79, %cst_30 {dimension_numbers = #tpu.dot_dimension_numbers<[1], [0], [0], [1], [0, 0, 1, 1], [], []>} : vector<17x128xbf16>, vector<128x128xbf16>, vector<17x128xf32> -> vector<17x128xf32>
    %c0_31 = arith.constant 0 : index
    %c0_32 = arith.constant 0 : index
    %c0_33 = arith.constant 0 : index
    %81 = vector.load %arg13[%c0_31, %c0_32, %c0_33] : memref<1x1x128xf32, #tpu.memory_space<vmem>>, vector<1x1x128xf32>
    %82 = vector.shape_cast %81 : vector<1x1x128xf32> to vector<1x128xf32>
    %83 = vector.broadcast %82 : vector<1x128xf32> to vector<17x128xf32>
    %84 = arith.addf %80, %83 : vector<17x128xf32>
    %c0_34 = arith.constant 0 : index
    %c0_35 = arith.constant 0 : index
    %c0_36 = arith.constant 0 : index
    %85 = vector.load %arg14[%c0_34, %c0_35, %c0_36] : memref<1x1x128xf32, #tpu.memory_space<vmem>>, vector<1x1x128xf32>
    %86 = vector.shape_cast %85 : vector<1x1x128xf32> to vector<1x128xf32>
    %87 = vector.broadcast %86 : vector<1x128xf32> to vector<17x128xf32>
    %88 = arith.mulf %84, %87 : vector<17x128xf32>
    %89 = arith.addf %3, %88 : vector<17x128xf32>
    %c0_37 = arith.constant 0 : index
    %c0_38 = arith.constant 0 : index
    %c0_39 = arith.constant 0 : index
    %90 = vector.load %arg15[%c0_37, %c0_38, %c0_39] : memref<1x1x128xf32, #tpu.memory_space<vmem>>, vector<1x1x128xf32>
    %91 = vector.shape_cast %90 : vector<1x1x128xf32> to vector<1x128xf32>
    %c0_40 = arith.constant 0 : index
    %c0_41 = arith.constant 0 : index
    %c0_42 = arith.constant 0 : index
    %92 = vector.load %arg16[%c0_40, %c0_41, %c0_42] : memref<1x1x128xf32, #tpu.memory_space<vmem>>, vector<1x1x128xf32>
    %93 = vector.shape_cast %92 : vector<1x1x128xf32> to vector<1x128xf32>
    %cst_43 = arith.constant dense<0.000000e+00> : vector<17xf32>
    %94 = vector.multi_reduction <add>, %89, %cst_43 [1] : vector<17x128xf32> to vector<17xf32>
    %95 = vector.shape_cast %94 : vector<17xf32> to vector<17x1xf32>
    %cst_44 = arith.constant 1.280000e+02 : f32
    %96 = vector.broadcast %cst_44 : f32 to vector<17x1xf32>
    %97 = arith.divf %95, %96 : vector<17x1xf32>
    %98 = vector.broadcast %97 : vector<17x1xf32> to vector<17x128xf32>
    %99 = arith.subf %89, %98 : vector<17x128xf32>
    %100 = arith.mulf %99, %99 : vector<17x128xf32>
    %cst_45 = arith.constant dense<0.000000e+00> : vector<17xf32>
    %101 = vector.multi_reduction <add>, %100, %cst_45 [1] : vector<17x128xf32> to vector<17xf32>
    %102 = vector.shape_cast %101 : vector<17xf32> to vector<17x1xf32>
    %cst_46 = arith.constant 1.280000e+02 : f32
    %103 = vector.broadcast %cst_46 : f32 to vector<17x1xf32>
    %104 = arith.divf %102, %103 : vector<17x1xf32>
    %105 = vector.broadcast %97 : vector<17x1xf32> to vector<17x128xf32>
    %106 = arith.subf %89, %105 : vector<17x128xf32>
    %cst_47 = arith.constant 9.99999997E-7 : f32
    %107 = vector.broadcast %cst_47 : f32 to vector<17x1xf32>
    %108 = arith.addf %104, %107 : vector<17x1xf32>
    %109 = math.rsqrt %108 : vector<17x1xf32>
    %110 = vector.broadcast %109 : vector<17x1xf32> to vector<17x128xf32>
    %111 = arith.mulf %106, %110 : vector<17x128xf32>
    %112 = vector.broadcast %91 : vector<1x128xf32> to vector<17x128xf32>
    %113 = arith.mulf %111, %112 : vector<17x128xf32>
    %114 = vector.broadcast %93 : vector<1x128xf32> to vector<17x128xf32>
    %115 = arith.addf %113, %114 : vector<17x128xf32>
    %116 = arith.truncf %115 : vector<17x128xf32> to vector<17x128xbf16>
    %c0_48 = arith.constant 0 : index
    %c0_49 = arith.constant 0 : index
    %c0_50 = arith.constant 0 : index
    %117 = vector.load %arg17[%c0_48, %c0_49, %c0_50] : memref<1x128x512xbf16, #tpu.memory_space<vmem>>, vector<1x128x512xbf16>
    %118 = vector.shape_cast %117 : vector<1x128x512xbf16> to vector<128x512xbf16>
    %cst_51 = arith.constant dense<0.000000e+00> : vector<17x512xf32>
    %119 = tpu.matmul %116, %118, %cst_51 {dimension_numbers = #tpu.dot_dimension_numbers<[1], [0], [0], [1], [0, 0, 1, 1], [], []>} : vector<17x128xbf16>, vector<128x512xbf16>, vector<17x512xf32> -> vector<17x512xf32>
    %c0_52 = arith.constant 0 : index
    %c0_53 = arith.constant 0 : index
    %c0_54 = arith.constant 0 : index
    %120 = vector.load %arg18[%c0_52, %c0_53, %c0_54] : memref<1x1x512xf32, #tpu.memory_space<vmem>>, vector<1x1x512xf32>
    %121 = vector.shape_cast %120 : vector<1x1x512xf32> to vector<1x512xf32>
    %122 = vector.broadcast %121 : vector<1x512xf32> to vector<17x512xf32>
    %123 = arith.addf %119, %122 : vector<17x512xf32>
    %cst_55 = arith.constant 5.000000e-01 : f32
    %124 = vector.broadcast %cst_55 : f32 to vector<17x512xf32>
    %125 = arith.mulf %124, %123 : vector<17x512xf32>
    %cst_56 = arith.constant 0.707106769 : f32
    %126 = vector.broadcast %cst_56 : f32 to vector<17x512xf32>
    %127 = arith.mulf %123, %126 : vector<17x512xf32>
    %128 = math.erf %127 : vector<17x512xf32>
    %cst_57 = arith.constant 1.000000e+00 : f32
    %129 = vector.broadcast %cst_57 : f32 to vector<17x512xf32>
    %130 = arith.addf %129, %128 : vector<17x512xf32>
    %131 = arith.mulf %125, %130 : vector<17x512xf32>
    %132 = arith.truncf %131 : vector<17x512xf32> to vector<17x512xbf16>
    %c0_58 = arith.constant 0 : index
    %c0_59 = arith.constant 0 : index
    %c0_60 = arith.constant 0 : index
    %133 = vector.load %arg19[%c0_58, %c0_59, %c0_60] : memref<1x512x128xbf16, #tpu.memory_space<vmem>>, vector<1x512x128xbf16>
    %134 = vector.shape_cast %133 : vector<1x512x128xbf16> to vector<512x128xbf16>
    %cst_61 = arith.constant dense<0.000000e+00> : vector<17x128xf32>
    %135 = tpu.matmul %132, %134, %cst_61 {dimension_numbers = #tpu.dot_dimension_numbers<[1], [0], [0], [1], [0, 0, 1, 1], [], []>} : vector<17x512xbf16>, vector<512x128xbf16>, vector<17x128xf32> -> vector<17x128xf32>
    %c0_62 = arith.constant 0 : index
    %c0_63 = arith.constant 0 : index
    %c0_64 = arith.constant 0 : index
    %136 = vector.load %arg20[%c0_62, %c0_63, %c0_64] : memref<1x1x128xf32, #tpu.memory_space<vmem>>, vector<1x1x128xf32>
    %137 = vector.shape_cast %136 : vector<1x1x128xf32> to vector<1x128xf32>
    %138 = vector.broadcast %137 : vector<1x128xf32> to vector<17x128xf32>
    %139 = arith.addf %135, %138 : vector<17x128xf32>
    %c0_65 = arith.constant 0 : index
    %c0_66 = arith.constant 0 : index
    %c0_67 = arith.constant 0 : index
    %140 = vector.load %arg21[%c0_65, %c0_66, %c0_67] : memref<1x1x128xf32, #tpu.memory_space<vmem>>, vector<1x1x128xf32>
    %141 = vector.shape_cast %140 : vector<1x1x128xf32> to vector<1x128xf32>
    %142 = vector.broadcast %141 : vector<1x128xf32> to vector<17x128xf32>
    %143 = arith.mulf %139, %142 : vector<17x128xf32>
    %144 = arith.addf %89, %143 : vector<17x128xf32>
    %c0_68 = arith.constant 0 : index
    %c0_69 = arith.constant 0 : index
    %145 = vector.load %arg25[%c0_68, %c0_69] : memref<17x128xf32, #tpu.memory_space<vmem>>, vector<17x128xf32>
    tpu.vector_store %arg25[%c0_68, %c0_69], %144 {strides = array<i32>} : memref<17x128xf32, #tpu.memory_space<vmem>>, vector<17x128xf32>,
    %c2_i32 = arith.constant 2 : i32
    %146 = arith.cmpi sge, %arg1, %c2_i32 : i32
    %147 = arith.extui %146 : i1 to i32
    %c0_i32_70 = arith.constant 0 : i32
    %148 = arith.cmpi ne, %147, %c0_i32_70 : i32
    scf.if %148 {
      %c0_71 = arith.constant 0 : index
      %c0_72 = arith.constant 0 : index
      %149 = vector.load %arg22[%c0_71, %c0_72] : memref<1x128xf32, #tpu.memory_space<vmem>>, vector<1x128xf32>
      %c0_73 = arith.constant 0 : index
      %c0_74 = arith.constant 0 : index
      %150 = vector.load %arg23[%c0_73, %c0_74] : memref<1x128xf32, #tpu.memory_space<vmem>>, vector<1x128xf32>
      %cst_75 = arith.constant dense<0.000000e+00> : vector<17xf32>
      %151 = vector.multi_reduction <add>, %144, %cst_75 [1] : vector<17x128xf32> to vector<17xf32>
      %152 = vector.shape_cast %151 : vector<17xf32> to vector<17x1xf32>
      %cst_76 = arith.constant 1.280000e+02 : f32
      %153 = vector.broadcast %cst_76 : f32 to vector<17x1xf32>
      %154 = arith.divf %152, %153 : vector<17x1xf32>
      %155 = vector.broadcast %154 : vector<17x1xf32> to vector<17x128xf32>
      %156 = arith.subf %144, %155 : vector<17x128xf32>
      %157 = arith.mulf %156, %156 : vector<17x128xf32>
      %cst_77 = arith.constant dense<0.000000e+00> : vector<17xf32>
      %158 = vector.multi_reduction <add>, %157, %cst_77 [1] : vector<17x128xf32> to vector<17xf32>
      %159 = vector.shape_cast %158 : vector<17xf32> to vector<17x1xf32>
      %cst_78 = arith.constant 1.280000e+02 : f32
      %160 = vector.broadcast %cst_78 : f32 to vector<17x1xf32>
      %161 = arith.divf %159, %160 : vector<17x1xf32>
      %162 = vector.broadcast %154 : vector<17x1xf32> to vector<17x128xf32>
      %163 = arith.subf %144, %162 : vector<17x128xf32>
      %cst_79 = arith.constant 9.99999997E-7 : f32
      %164 = vector.broadcast %cst_79 : f32 to vector<17x1xf32>
      %165 = arith.addf %161, %164 : vector<17x1xf32>
      %166 = math.rsqrt %165 : vector<17x1xf32>
      %167 = vector.broadcast %166 : vector<17x1xf32> to vector<17x128xf32>
      %168 = arith.mulf %163, %167 : vector<17x128xf32>
      %169 = vector.broadcast %149 : vector<1x128xf32> to vector<17x128xf32>
      %170 = arith.mulf %168, %169 : vector<17x128xf32>
      %171 = vector.broadcast %150 : vector<1x128xf32> to vector<17x128xf32>
      %172 = arith.addf %170, %171 : vector<17x128xf32>
      %c0_80 = arith.constant 0 : index
      %c0_81 = arith.constant 0 : index
      %c0_82 = arith.constant 0 : index
      %c0_83 = arith.constant 0 : index
      %173 = vector.load %arg24[%c0_80, %c0_81, %c0_82, %c0_83] : memref<1x1x17x128xf32, #tpu.memory_space<vmem>>, vector<1x1x17x128xf32>
      %174 = vector.shape_cast %173 : vector<1x1x17x128xf32> to vector<17x128xf32>
      %175 = vector.shape_cast %172 : vector<17x128xf32> to vector<1x1x17x128xf32>
      tpu.vector_store %arg24[%c0_80, %c0_81, %c0_82, %c0_83], %175 {strides = array<i32>} : memref<1x1x17x128xf32, #tpu.memory_space<vmem>>, vector<1x1x17x128xf32>,
    } else {
    }
    return
  }
  func.func @transform_0(%arg0: i32, %arg1: i32) -> (i32, i32, i32) {
    %c0_i32 = arith.constant 0 : i32
    %c0_i32_0 = arith.constant 0 : i32
    %c0_i32_1 = arith.constant 0 : i32
    return %arg0, %c0_i32, %c0_i32_0 : i32, i32, i32
  }
  func.func @transform_1(%arg0: i32, %arg1: i32) -> (i32, i32) {
    %c0_i32 = arith.constant 0 : i32
    %c0_i32_0 = arith.constant 0 : i32
    %c0_i32_1 = arith.constant 0 : i32
    return %c0_i32, %c0_i32_0 : i32, i32
  }
  func.func @transform_2(%arg0: i32, %arg1: i32) -> (i32, i32) {
    %c0_i32 = arith.constant 0 : i32
    %c0_i32_0 = arith.constant 0 : i32
    %c0_i32_1 = arith.constant 0 : i32
    return %c0_i32, %c0_i32_0 : i32, i32
  }
  func.func @transform_3(%arg0: i32, %arg1: i32) -> (i32, i32) {
    %c0_i32 = arith.constant 0 : i32
    %c0_i32_0 = arith.constant 0 : i32
    %c0_i32_1 = arith.constant 0 : i32
    return %c0_i32, %c0_i32_0 : i32, i32
  }
  func.func @transform_4(%arg0: i32, %arg1: i32) -> (i32, i32) {
    %c0_i32 = arith.constant 0 : i32
    %c0_i32_0 = arith.constant 0 : i32
    %c0_i32_1 = arith.constant 0 : i32
    return %c0_i32, %c0_i32_0 : i32, i32
  }
  func.func @transform_5(%arg0: i32, %arg1: i32) -> (i32, i32) {
    %c0_i32 = arith.constant 0 : i32
    %c0_i32_0 = arith.constant 0 : i32
    %c0_i32_1 = arith.constant 0 : i32
    return %c0_i32, %c0_i32_0 : i32, i32
  }
  func.func @transform_6(%arg0: i32, %arg1: i32) -> (i32, i32, i32) {
    %c0_i32 = arith.constant 0 : i32
    %c0_i32_0 = arith.constant 0 : i32
    %c0_i32_1 = arith.constant 0 : i32
    return %arg1, %c0_i32, %c0_i32_0 : i32, i32, i32
  }
  func.func @transform_7(%arg0: i32, %arg1: i32) -> (i32, i32, i32) {
    %c0_i32 = arith.constant 0 : i32
    %c0_i32_0 = arith.constant 0 : i32
    %c0_i32_1 = arith.constant 0 : i32
    return %arg1, %c0_i32, %c0_i32_0 : i32, i32, i32
  }
  func.func @transform_8(%arg0: i32, %arg1: i32) -> (i32, i32, i32) {
    %c0_i32 = arith.constant 0 : i32
    %c0_i32_0 = arith.constant 0 : i32
    %c0_i32_1 = arith.constant 0 : i32
    return %arg1, %c0_i32, %c0_i32_0 : i32, i32, i32
  }
  func.func @transform_9(%arg0: i32, %arg1: i32) -> (i32, i32, i32) {
    %c0_i32 = arith.constant 0 : i32
    %c0_i32_0 = arith.constant 0 : i32
    %c0_i32_1 = arith.constant 0 : i32
    return %arg1, %c0_i32, %c0_i32_0 : i32, i32, i32
  }
  func.func @transform_10(%arg0: i32, %arg1: i32) -> (i32, i32, i32) {
    %c0_i32 = arith.constant 0 : i32
    %c0_i32_0 = arith.constant 0 : i32
    %c0_i32_1 = arith.constant 0 : i32
    return %arg1, %c0_i32, %c0_i32_0 : i32, i32, i32
  }
  func.func @transform_11(%arg0: i32, %arg1: i32) -> (i32, i32, i32) {
    %c0_i32 = arith.constant 0 : i32
    %c0_i32_0 = arith.constant 0 : i32
    %c0_i32_1 = arith.constant 0 : i32
    return %arg1, %c0_i32, %c0_i32_0 : i32, i32, i32
  }
  func.func @transform_12(%arg0: i32, %arg1: i32) -> (i32, i32, i32) {
    %c0_i32 = arith.constant 0 : i32
    %c0_i32_0 = arith.constant 0 : i32
    %c0_i32_1 = arith.constant 0 : i32
    return %arg1, %c0_i32, %c0_i32_0 : i32, i32, i32
  }
  func.func @transform_13(%arg0: i32, %arg1: i32) -> (i32, i32, i32) {
    %c0_i32 = arith.constant 0 : i32
    %c0_i32_0 = arith.constant 0 : i32
    %c0_i32_1 = arith.constant 0 : i32
    return %arg1, %c0_i32, %c0_i32_0 : i32, i32, i32
  }
  func.func @transform_14(%arg0: i32, %arg1: i32) -> (i32, i32, i32) {
    %c0_i32 = arith.constant 0 : i32
    %c0_i32_0 = arith.constant 0 : i32
    %c0_i32_1 = arith.constant 0 : i32
    return %arg1, %c0_i32, %c0_i32_0 : i32, i32, i32
  }
  func.func @transform_15(%arg0: i32, %arg1: i32) -> (i32, i32, i32) {
    %c0_i32 = arith.constant 0 : i32
    %c0_i32_0 = arith.constant 0 : i32
    %c0_i32_1 = arith.constant 0 : i32
    return %arg1, %c0_i32, %c0_i32_0 : i32, i32, i32
  }
  func.func @transform_16(%arg0: i32, %arg1: i32) -> (i32, i32, i32) {
    %c0_i32 = arith.constant 0 : i32
    %c0_i32_0 = arith.constant 0 : i32
    %c0_i32_1 = arith.constant 0 : i32
    return %arg1, %c0_i32, %c0_i32_0 : i32, i32, i32
  }
  func.func @transform_17(%arg0: i32, %arg1: i32) -> (i32, i32, i32) {
    %c0_i32 = arith.constant 0 : i32
    %c0_i32_0 = arith.constant 0 : i32
    %c0_i32_1 = arith.constant 0 : i32
    return %arg1, %c0_i32, %c0_i32_0 : i32, i32, i32
  }
  func.func @transform_18(%arg0: i32, %arg1: i32) -> (i32, i32, i32) {
    %c0_i32 = arith.constant 0 : i32
    %c0_i32_0 = arith.constant 0 : i32
    %c0_i32_1 = arith.constant 0 : i32
    return %arg1, %c0_i32, %c0_i32_0 : i32, i32, i32
  }
  func.func @transform_19(%arg0: i32, %arg1: i32) -> (i32, i32, i32) {
    %c0_i32 = arith.constant 0 : i32
    %c0_i32_0 = arith.constant 0 : i32
    %c0_i32_1 = arith.constant 0 : i32
    return %arg1, %c0_i32, %c0_i32_0 : i32, i32, i32
  }
  func.func @transform_20(%arg0: i32, %arg1: i32) -> (i32, i32) {
    %c0_i32 = arith.constant 0 : i32
    %c0_i32_0 = arith.constant 0 : i32
    %c0_i32_1 = arith.constant 0 : i32
    return %c0_i32, %c0_i32_0 : i32, i32
  }
  func.func @transform_21(%arg0: i32, %arg1: i32) -> (i32, i32) {
    %c0_i32 = arith.constant 0 : i32
    %c0_i32_0 = arith.constant 0 : i32
    %c0_i32_1 = arith.constant 0 : i32
    return %c0_i32, %c0_i32_0 : i32, i32
  }
  func.func @transform_22(%arg0: i32, %arg1: i32) -> (i32, i32, i32, i32) {
    %c2_i32 = arith.constant 2 : i32
    %0 = arith.subi %arg1, %c2_i32 : i32
    %c0_i32 = arith.constant 0 : i32
    %1 = arith.maxsi %0, %c0_i32 : i32
    %c0_i32_0 = arith.constant 0 : i32
    %c0_i32_1 = arith.constant 0 : i32
    %c0_i32_2 = arith.constant 0 : i32
    return %1, %arg0, %c0_i32_0, %c0_i32_1 : i32, i32, i32, i32
  }
}

</mosaic_0001>

<bundles_post_ra>
// kernel: _lambda_.1
= control target key start
LH: loop header
LB: loop body
LE: loop exit
PB: predicated region body
PF: predicated region fallthrough
CT: control target
= control target key end

     0   :  { %s4214_s28 = smov 0   ;;  %s4216_s29 = smov 0   ;;  %s4801_s0 = inlined_call_operand.vmem [shape: f32[2,16,588], index: 0, kind: input, shape index: {}]   ;;  %s4802_s1 = inlined_call_operand.vmem [shape: bf16[588,128], index: 1, kind: input, shape index: {}]   ;;  %s4803_s2 = inlined_call_operand.vmem [shape: f32[1,128], index: 2, kind: input, shape index: {}, may-alias: {2,21}]   ;;  %s4804_s3 = inlined_call_operand.vmem [shape: f32[1,128], index: 3, kind: input, shape index: {}]   ;;  %s4805_s4 = inlined_call_operand.vmem [shape: f32[1,128], index: 4, kind: input, shape index: {}]   ;;  %s4806_s5 = inlined_call_operand.vmem [shape: f32[16,128], index: 5, kind: input, shape index: {}]   ;;  %s4807_s6 = inlined_call_operand.vmem [shape: f32[6,1,128], index: 6, kind: input, shape index: {}, may-alias: {6,13}]   ;;  %s4808_s7 = inlined_call_operand.vmem [shape: f32[6,1,128], index: 7, kind: input, shape index: {}, may-alias: {7,11,14,18}]   ;;  %s4809_s8 = inlined_call_operand.vmem [shape: bf16[6,128,384], index: 8, kind: input, shape index: {}]   ;;  %s4810_s9 = inlined_call_operand.vmem [shape: f32[6,1,384], index: 9, kind: input, shape index: {}]   ;;  %s4811_s10 = inlined_call_operand.vmem [shape: bf16[6,128,128], index: 10, kind: input, shape index: {}]   ;;  %s4812_s11 = inlined_call_operand.vmem [shape: f32[6,1,128], index: 11, kind: input, shape index: {}, may-alias: {7,11,14,18}]   ;;  %s4813_s12 = inlined_call_operand.vmem [shape: f32[6,1,128], index: 12, kind: input, shape index: {}, may-alias: {12,19}]   ;;  %s4814_s13 = inlined_call_operand.vmem [shape: f32[6,1,128], index: 13, kind: input, shape index: {}, may-alias: {6,13}]   ;;  %s4815_s14 = inlined_call_operand.vmem [shape: f32[6,1,128], index: 14, kind: input, shape index: {}, may-alias: {7,11,14,18}]   ;;  %s4816_s15 = inlined_call_operand.vmem [shape: bf16[6,128,512], index: 15, kind: input, shape index: {}]   ;;  %s4817_s16 = inlined_call_operand.vmem [shape: f32[6,1,512], index: 16, kind: input, shape index: {}]   ;;  %s4818_s17 = inlined_call_operand.vmem [shape: bf16[6,512,128], index: 17, kind: input, shape index: {}]   ;;  %s4819_s18 = inlined_call_operand.vmem [shape: f32[6,1,128], index: 18, kind: input, shape index: {}, may-alias: {7,11,14,18}]   ;;  %s4820_s19 = inlined_call_operand.vmem [shape: f32[6,1,128], index: 19, kind: input, shape index: {}, may-alias: {12,19}]   ;;  %s4821_s20 = inlined_call_operand.vmem [shape: f32[1,128], index: 20, kind: input, shape index: {}]   ;;  %s4822_s21 = inlined_call_operand.vmem [shape: f32[1,128], index: 21, kind: input, shape index: {}, may-alias: {2,21}]   ;;  %s4823_s22 = inlined_call_operand.vmem [shape: f32[4,2,17,128], index: 22, kind: output, shape index: {}]  }
   0x1   :  { %4830 = sst [smem:[#allocation9_spill]] %s4801_s0  ;;  %s4218_s30 = smov 0  }
   0x2   :  { %4831 = sst [smem:[#allocation10_spill]] %s4802_s1 }
   0x3   :  { %4832 = sst [smem:[#allocation11_spill]] %s4803_s2 }
   0x4   :  { %4833 = sst [smem:[#allocation12_spill]] %s4804_s3  ;;  %s4212_s3 = smov 0  }
   0x5   :  { %4834 = sst [smem:[#allocation13_spill]] %s4805_s4  ;;  %s4220_s4 = smov 0  }
   0x6   :  { %4835 = sst [smem:[#allocation14_spill]] %s4806_s5 }
   0x7   :  { %4836 = sst [smem:[#allocation15_spill]] %s4807_s6 }
   0x8   :  { %4837 = sst [smem:[#allocation16_spill]] %s4808_s7 }
   0x9   :  { %4838 = sst [smem:[#allocation17_spill]] %s4809_s8 }
   0xa   :  { %4839 = sst [smem:[#allocation18_spill]] %s4810_s9 }
   0xb   :  { %4840 = sst [smem:[#allocation19_spill]] %s4811_s10 }
   0xc   :  { %4841 = sst [smem:[#allocation20_spill]] %s4815_s14 }
   0xd   :  { %4842 = sst [smem:[#allocation21_spill]] %s4816_s15 }
   0xe   :  { %4843 = sst [smem:[#allocation22_spill]] %s4817_s16 }
   0xf   :  { %4844 = sst [smem:[#allocation23_spill]] %s4818_s17 }
  0x10   :  { %4845 = sst [smem:[#allocation24_spill]] %s4819_s18 }
  0x11   :  { %4846 = sst [smem:[#allocation25_spill]] %s4820_s19 }
  0x12   :  { %4847 = sst [smem:[#allocation26_spill]] %s4821_s20 }
  0x13   :  { %4848 = sst [smem:[#allocation27_spill]] %s4822_s21 }
  0x14   :  { %4849 = sst [smem:[#allocation28_spill]] %s4823_s22 }
  0x15 LB: > { %4850 = sst [smem:[#allocation3_spill]] %s4075_s3  ;;  %s41_s0 = sadd.s32 1, %s4083_s29  ;;  %s4091_s4 = sphi %s4220_s4, %s32_s4   ;;  %s4087_s30 = sphi %s4218_s30, %s4893_s30   ;;  %s4083_s29 = sphi %s4216_s29, %s4892_s29   ;;  %s4079_s28 = sphi %s4214_s28, %s4891_s28   ;;  %s4075_s3 = sphi %s4212_s3, %s4890_s3  }
  0x16   : > { %4851 = sst [smem:[#allocation4_spill]] %s4083_s29  ;;  %s44_s23 = sadd.s32 1, %s4087_s30 }
  0x17   : > { %4852 = sst [smem:[#allocation5_spill]] %s4087_s30  ;;  %p42_p0 = scmp.ge.s32.totalorder %s41_s0, 6 }
  0x18   : > { %4853 = sst [smem:[#allocation6_spill]] %s4091_s4  ;;  %p3365_p1 = scmp.ge.s32.totalorder %s4091_s4, 1 }
  0x19   : > { %p754_p2 = scmp.lt.s32.totalorder %s4091_s4, 13  ;;  %s4895_s0 = smov (%p42_p0, %s41_s0), 0 }
  0x1a   : > { %4854 = sst [smem:[#allocation7_spill]] %s4895_s0  ;;  %s4897_s23 = smov (!%p42_p0, %s44_s23), %s4087_s30 }
  0x1b   : > { %p755_p3 = pnand %p3365_p1, %p754_p2  ;;  %p46_p4 = scmp.ge.s32.totalorder %s4897_s23, 2 }
  0x1c   : > { %p875_p5 = scmp.lt.s32.totalorder (!%p755_p3), %s4079_s28, 1  ;;  %p880_p6 = scmp.lt.s32.totalorder (!%p755_p3), %s4075_s3, 5 }
  0x1d   : > { %s4899_s23 = smov (%p46_p4, %s4897_s23), 0  ;;  %758 = sbr.rel (%p755_p3) target bundleno = 3330 (0xd02), region = 108 }
  0x1e   : > { %4855 = sst [smem:[#allocation8_spill]] %s4899_s23  ;;  %s3375_s1 = sadd.s32 (!%p755_p3), 4294967294, %s4075_s3 }
  0x1f   : > { %p933_p7 = scmp.gt.s32.totalorder (!%p755_p3), %s3375_s1, 0  ;;  %s4858_s4 = sld [smem:[#allocation9_spill]] (!%p755_p3) }
  0x20   : > { %s4859_s8 = sld [smem:[#allocation17_spill]] (!%p755_p3)  ;;  %s4860_s10 = sld [smem:[#allocation19_spill]] (!%p755_p3) }
  0x21   : > { %s4861_s9 = sld [smem:[#allocation18_spill]] (!%p755_p3)  ;;  %s4863_s15 = sld [smem:[#allocation21_spill]] (!%p755_p3) }
  0x22   : > { %s4864_s16 = sld [smem:[#allocation22_spill]] (!%p755_p3)  ;;  %s4865_s17 = sld [smem:[#allocation23_spill]] (!%p755_p3) }
  0x23   : > { %s4867_s27 = sld [smem:[#allocation25_spill]] (!%p755_p3)  ;;  %p3376_p8 = scmp.lt.s32.totalorder (!%p755_p3), %s3375_s1, 3 }
  0x24   : > { %s4901_s28 = smov (!%p875_p5, %s4079_s28), 1 }
  0x25   : > { %s4249_s5 = scalar_select %p880_p6, %s4075_s3, 5 }
  0x26   : > { %s3776_s24 = smul.u32 80, %s4901_s28 }
  0x27   : > { %s3777_s20 = smul.u32 192, %s4249_s5  ;;  %s3539_s22 = sshll.u32 %s4249_s5, 6 }
  0x28   : > { %s4263_s21 = scalar_lea.vmem %s4858_s4, %s3776_s24  ;;  %s3778_s3 = smul.u32 3, %s4249_s5 }
  0x29   : > { %s4271_s6 = scalar_lea.vmem %s4859_s8, %s3777_s20  ;;  %s4276_s23 = scalar_lea.vmem %s4860_s10, %s3539_s22 }
  0x2a   : > { %s4281_s30 = scalar_lea.vmem %s4861_s9, %s3778_s3  ;;  %s3540_s10 = sshll.u32 %s4249_s5, 8 }
  0x2b   : > { %s4303_s29 = scalar_lea.vmem %s4863_s15, %s3540_s10  ;;  %s3372_s4 = sshll.u32 %s4249_s5, 2 }
  0x2c   : > { %s4309_s7 = scalar_lea.vmem %s4864_s16, %s3372_s4  ;;  %s4314_s19 = scalar_lea.vmem %s4865_s17, %s3540_s10 }
  0x2d   : > { %s4866_s22 = sld [smem:[#allocation24_spill]]  ;;  %s931_s3 = scalar_lea.vmem %s4867_s27, %s4249_s5 }
  0x2e   : > { %s934_s15 = scalar_select %p933_p7, %s3375_s1, 0 }
  0x2f   : > { %s3779_s14 = smul.u32 3, %s4901_s28  ;;  %s4868_s10 = sld [smem:[#allocation28_spill]] }
  0x30   : > { %s4903_s15 = smov (!%p3376_p8, %s934_s15), 3  ;;  %s4869_s17 = sld [smem:[#allocation3_spill]] }
  0x31   : > { %s3780_s0 = smul.u32 6, %s4903_s15 }
  0x33   : > { %s928_s8 = scalar_lea.vmem %s4866_s22, %s4249_s5  ;;  %s941_s4 = sadd.s32 %s3780_s0, %s3779_s14 }
  0x34   : > { %s3381_s24 = sshll.u32 %s941_s4, 3 }
  0x35   : > { %s4329_s2 = scalar_lea.vmem %s4868_s10, %s3381_s24 }
  0x36   : > { %p3382_p9 = scmp.ne.s32.totalorder %s4869_s17, 0 }
  0x37   : > { %s4870_s9 = sld [smem:[#allocation10_spill]] (!%p3382_p9)  ;;  %v953_v31 = vld [vmem:[%s4263_s21 + $0x8] sm:$0xff] (!%p3382_p9)  ;;  %v958_v32 = vld [vmem:[%s4263_s21 + $0x30] sm:$0xff] (!%p3382_p9)  ;;  %v952_v35 = vld [vmem:[%s4263_s21] sm:$0xff] (!%p3382_p9)  ;;  %v4093_v36 = vmov (!%p3382_p9), 0.0   ;;  %vm4094_vm0 = vmmov (!%p3382_p9), 0  }
  0x38   : > { %951 = sbr.rel (%p3382_p9) target bundleno = 336 (0x150), region = 112  ;;  %v963_v33 = vpack.c.bf16 (!%p3382_p9), %v958_v32, %v953_v31  ;;  %v957_v37 = vld [vmem:[%s4263_s21 + $0x28] sm:$0xff] (!%p3382_p9)  ;;  %v955_v38 = vld [vmem:[%s4263_s21 + $0x18] sm:$0xff] (!%p3382_p9)  ;;  %v960_v39 = vld [vmem:[%s4263_s21 + $0x40] sm:$0xff] (!%p3382_p9)  ;;  %vm1273_vm1 = vcmask (!%p3382_p9), 1045504   ;;  %vm1269_vm2 = vcmask (!%p3382_p9), 621568  }
  0x39   : > { %v962_v40 = vpack.c.bf16 (!%p3382_p9), %v957_v37, %v952_v35  ;;  %v965_v41 = vpack.c.bf16 (!%p3382_p9), %v960_v39, %v955_v38  ;;  %v954_v43 = vld [vmem:[%s4263_s21 + $0x10] sm:$0xff] (!%p3382_p9)  ;;  %v959_v44 = vld [vmem:[%s4263_s21 + $0x38] sm:$0xff] (!%p3382_p9)  ;;  %v956_v50 = vld [vmem:[%s4263_s21 + $0x20] sm:$0xff] (!%p3382_p9)  ;;  %s4871_s4 = sld [smem:[#allocation11_spill]] (!%p3382_p9)  ;;  %s4872_s18 = sld [smem:[#allocation14_spill]] (!%p3382_p9)  ;;  %vm1409_vm3 = vcmask (!%p3382_p9), 1040384  }
  0x3a   : > { %1309 = vmatprep.mubr.bf16.mxu0 (!%p3382_p9), %v963_v33  ;;  %v964_v45 = vpack.c.bf16 (!%p3382_p9), %v959_v44, %v954_v43  ;;  %v961_v51 = vld [vmem:[%s4263_s21 + $0x48] sm:$0xff] (!%p3382_p9)  ;;  %s4873_s26 = sld [smem:[#allocation12_spill]] (!%p3382_p9)  ;;  %s4874_s15 = sld [smem:[#allocation13_spill]] (!%p3382_p9) }
  0x3b   : > { %1350 = vmatprep.mubr.bf16.mxu1 (!%p3382_p9), %v965_v41  ;;  %v966_v53 = vpack.c.bf16 (!%p3382_p9), %v961_v51, %v956_v50 }
  0x3d   : > { %v3825_v0 = vld [vmem:[%s4870_s9 + $0x40] sm:$0xff] (!%p3382_p9)   ;;  %v3829_v4 = vld [vmem:[%s4870_s9 + $0x48] sm:$0xff] (!%p3382_p9)   ;;  %v3833_v8 = vld [vmem:[%s4870_s9 + $0x50] sm:$0xff] (!%p3382_p9)  }
  0x3e   : > { %v3826_v1 = vld [vmem:[%s4870_s9] sm:$0xff] (!%p3382_p9)   ;;  %3544 = vmatprep.subr.bf16.mxu0 (!%p3382_p9), %v3825_v0  ;;  %v3830_v5 = vld [vmem:[%s4870_s9 + $0x8] sm:$0xff] (!%p3382_p9)   ;;  %v3834_v9 = vld [vmem:[%s4870_s9 + $0x10] sm:$0xff] (!%p3382_p9)  }
  0x3f   : > { %v3827_v2 = vld [vmem:[%s4870_s9 + $0xc0] sm:$0xff]   ;;  %3545 = vmatpush3.bf16.msra.mxu0 %v3826_v1  ;;  %v3831_v6 = vld [vmem:[%s4870_s9 + $0xc8] sm:$0xff]   ;;  %v3835_v10 = vld [vmem:[%s4870_s9 + $0xd0] sm:$0xff]  }
  0x40   : > { %v3828_v3 = vld [vmem:[%s4870_s9 + $0x80] sm:$0xff]   ;;  %3566 = vmatprep.subr.bf16.mxu1 %v3827_v2  ;;  %3546 = vmatprep.subr.bf16.mxu0 %v3829_v4  ;;  %v3832_v7 = vld [vmem:[%s4870_s9 + $0x88] sm:$0xff]   ;;  %v3836_v11 = vld [vmem:[%s4870_s9 + $0x90] sm:$0xff]  }
  0x41   : > { %3567 = vmatpush3.bf16.msra.mxu1 %v3828_v3  ;;  %v3837_v12 = vld [vmem:[%s4870_s9 + $0x58] sm:$0xff]   ;;  %v3841_v16 = vld [vmem:[%s4870_s9 + $0x60] sm:$0xff]   ;;  %v3845_v20 = vld [vmem:[%s4870_s9 + $0x68] sm:$0xff]  }
  0x42   : > { %3568 = vmatprep.subr.bf16.mxu1 %v3831_v6  ;;  %v3838_v13 = vld [vmem:[%s4870_s9 + $0x18] sm:$0xff]   ;;  %v3842_v17 = vld [vmem:[%s4870_s9 + $0x20] sm:$0xff]   ;;  %v3846_v21 = vld [vmem:[%s4870_s9 + $0x28] sm:$0xff]  }
  0x43   : > { %3547 = vmatpush3.bf16.msra.mxu0 %v3830_v5  ;;  %v3839_v14 = vld [vmem:[%s4870_s9 + $0xd8] sm:$0xff]   ;;  %v3843_v18 = vld [vmem:[%s4870_s9 + $0xe0] sm:$0xff]   ;;  %v3847_v22 = vld [vmem:[%s4870_s9 + $0xe8] sm:$0xff]  }
  0x44   : > { %3548 = vmatprep.subr.bf16.mxu0 %v3833_v8  ;;  %v3840_v15 = vld [vmem:[%s4870_s9 + $0x98] sm:$0xff]   ;;  %v3844_v19 = vld [vmem:[%s4870_s9 + $0xa0] sm:$0xff]   ;;  %v3848_v23 = vld [vmem:[%s4870_s9 + $0xa8] sm:$0xff]  }
  0x45   : > { %3569 = vmatpush3.bf16.msra.mxu1 %v3832_v7  ;;  %v3849_v24 = vld [vmem:[%s4870_s9 + $0x70] sm:$0xff]   ;;  %v3853_v28 = vld [vmem:[%s4870_s9 + $0x78] sm:$0xff]   ;;  %v3857_v42 = vld [vmem:[%s4870_s9 + $0x100] sm:$0xff]  }
  0x46   : > { %3570 = vmatprep.subr.bf16.mxu1 %v3835_v10  ;;  %v3850_v25 = vld [vmem:[%s4870_s9 + $0x30] sm:$0xff]   ;;  %v3854_v29 = vld [vmem:[%s4870_s9 + $0x38] sm:$0xff]   ;;  %v3858_v46 = vld [vmem:[%s4870_s9 + $0x108] sm:$0xff]  }
  0x47   : > { %3549 = vmatpush3.bf16.msra.mxu0 %v3834_v9  ;;  %v3851_v26 = vld [vmem:[%s4870_s9 + $0xf0] sm:$0xff]   ;;  %v3855_v30 = vld [vmem:[%s4870_s9 + $0xf8] sm:$0xff]   ;;  %v3861_v49 = vld [vmem:[%s4870_s9 + $0x120] sm:$0x3f]  }
  0x48   : > { %3550 = vmatprep.subr.bf16.mxu0 %v3837_v12  ;;  %v3852_v27 = vld [vmem:[%s4870_s9 + $0xb0] sm:$0xff]   ;;  %v3856_v34 = vld [vmem:[%s4870_s9 + $0xb8] sm:$0xff]   ;;  %v1275_v52 = vsel %vm1273_vm1, %v3861_v49, 0  ;;  %v3383_v55 = vld [vmem:[%s4871_s4] ss:$0 sm:$0xff] }
  0x49   : > { %3571 = vmatpush3.bf16.msra.mxu1 %v3836_v11  ;;  %v3859_v47 = vld [vmem:[%s4870_s9 + $0x110] sm:$0xff]   ;;  %v3860_v48 = vld [vmem:[%s4870_s9 + $0x118] sm:$0xff]   ;;  %v1400_v8 = vld [vmem:[%s4872_s18] sm:$0xff] }
  0x4a   : > { %3572 = vmatprep.subr.bf16.mxu1 %v3839_v14  ;;  %v1404_v9 = vld [vmem:[%s4873_s26] sm:$0x1]  ;;  %v1401_v14 = vld [vmem:[%s4872_s18 + $0x8] sm:$0xff] }
  0x4b   : > { %3551 = vmatpush3.bf16.msra.mxu0 %v3838_v13  ;;  %v1405_v10 = vld [vmem:[%s4874_s15] sm:$0x1] }
  0x4c   : > { %3552 = vmatprep.subr.bf16.mxu0 %v3841_v16  ;;  %v1406_v16 = vadd.f32 %v1405_v10, %v1404_v9 }
  0x4d   : > { %3573 = vmatpush3.bf16.msra.mxu1 %v3840_v15 }
  0x4e   : > { %3574 = vmatprep.subr.bf16.mxu1 %v3843_v18 }
  0x4f   : > { %3553 = vmatpush3.bf16.msra.mxu0 %v3842_v17 }
  0x50   : > { %3554 = vmatprep.subr.bf16.mxu0 %v3845_v20 }
  0x51   : > { %3575 = vmatpush3.bf16.msra.mxu1 %v3844_v19 }
  0x52   : > { %3576 = vmatprep.subr.bf16.mxu1 %v3847_v22 }
  0x53   : > { %3555 = vmatpush3.bf16.msra.mxu0 %v3846_v21 }
  0x54   : > { %3556 = vmatprep.subr.bf16.mxu0 %v3849_v24 }
  0x55   : > { %3577 = vmatpush3.bf16.msra.mxu1 %v3848_v23 }
  0x56   : > { %3578 = vmatprep.subr.bf16.mxu1 %v3851_v26 }
  0x57   : > { %3557 = vmatpush3.bf16.msra.mxu0 %v3850_v25 }
  0x58   : > { %3558 = vmatprep.subr.bf16.mxu0 %v3853_v28 }
  0x59   : > { %3579 = vmatpush3.bf16.msra.mxu1 %v3852_v27 }
  0x5a   : > { %3580 = vmatprep.subr.bf16.mxu1 %v3855_v30 }
  0x5b   : > { %3559 = vmatpush3.bf16.msra.mxu0 %v3854_v29 }
  0x5c   : > { %3686 = vmatprep.subr.bf16.mxu0 %v4093_v36 }
  0x5d   : > { %3581 = vmatpush3.bf16.msra.mxu1 %v3856_v34 }
  0x5e   : > { %1310 = vmatmul.mubr.bf16.vlgmr.msra.gmra.mrb[0].mxu0 %v962_v40 }
  0x5f   : > { %3687 = vmatpush3.bf16.msra.mxu0 %v3857_v42  ;;  %3696 = vmatprep.mubr.msk.bf16.mxu0 %vm4094_vm0, %v4093_v36 }
  0x60   : > { %1351 = vmatmul.mubr.bf16.vlgmr.msra.gmra.mrb[0].mxu1 %v964_v45  ;;  %3688 = vmatprep.subr.bf16.mxu0 %v4093_v36 }
  0x63   : > { %3689 = vmatpush3.bf16.msra.mxu0 %v3858_v46 }
  0x64   : > { %3690 = vmatprep.subr.bf16.mxu0 %v4093_v36 }
  0x67   : > { %3691 = vmatpush3.bf16.msra.mxu0 %v3859_v47 }
  0x68   : > { %3692 = vmatprep.subr.bf16.mxu0 %v4093_v36 }
  0x6b   : > { %3693 = vmatpush3.bf16.msra.mxu0 %v3860_v48 }
  0x6c   : > { %3694 = vmatprep.subr.bf16.mxu0 %v4093_v36 }
  0x6f   : > { %3695 = vmatpush3.bf16.msra.mxu0 %v1275_v52 }
  0x72   : > { %3697 = vmatmul.mubr.msk.bf16.vlgmr.msra.gmra.mrb[4].mxu0 %vm1269_vm2, %v966_v53 }
 0x131   : > { %v3560_v54 = vpop.f32.mrb[0].mxu0 }
 0x132   : > { %v3561_v56 = vpop.f32.mrb[1].mxu0 }
 0x133   : > { %v3562_v57 = vadd.f32 %v3561_v56, %v3560_v54  ;;  %v3563_v58 = vpop.f32.mrb[2].mxu0  ;;  %v3582_v59 = vpop.f32.mrb[0].mxu1 }
 0x134   : > { %v3564_v60 = vpop.f32.mrb[3].mxu0  ;;  %v3583_v61 = vpop.f32.mrb[1].mxu1 }
 0x135   : > { %v1312_v62 = vadd.f32 %v3562_v57, %v3383_v55  ;;  %v3565_v63 = vadd.f32 %v3564_v60, %v3563_v58  ;;  %v3584_v0 = vadd.f32 %v3583_v61, %v3582_v59  ;;  %v3585_v1 = vpop.f32.mrb[2].mxu1 }
 0x136   : > { %v3586_v2 = vpop.f32.mrb[3].mxu1 }
 0x137   : > { %v1315_v3 = vadd.f32 %v3565_v63, %v3383_v55  ;;  %v3587_v4 = vadd.f32 %v3586_v2, %v3585_v1  ;;  %v1353_v5 = vadd.f32 %v3584_v0, %v1312_v62 }
 0x139   : > { %v1356_v6 = vadd.f32 %v3587_v4, %v1315_v3 }
 0x145   : > { %v1393_v7 = vpop.f32.mrb[4].mxu0 }
 0x146   : > { %v1394_v11 = vadd.f32 %v1393_v7, %v1353_v5  ;;  %v3698_v12 = vpop.f32.mrb[5].mxu0 }
 0x147   : > { %v1396_v13 = vpop.f32.mrb[6].mxu0 }
 0x148   : > { %v1402_v15 = vadd.f32 %v1400_v8, %v1394_v11  ;;  %v1397_v17 = vadd.f32 %v1396_v13, %v1356_v6  ;;  %v3699_v18 = vpop.f32.mrb[7].mxu0 }
 0x14a   : > { %v1410_v19 = vrot.slane %v1402_v15, 7  ;;  %v1403_v20 = vadd.f32 %v1401_v14, %v1397_v17 }
 0x14c   : > { %v1416_v21 = vsel %vm1409_vm3, %v1406_v16, %v1410_v19  ;;  %v1411_v22 = vrot.slane %v1403_v20, 7 }
 0x14d   : > { %1417 = vst [vmem:[#allocation2] sm:$0xff] %v1416_v21 }
 0x14e   : > { %v1412_v23 = vsel %vm1409_vm3, %v1410_v19, %v1411_v22  ;;  %1419 = vst [vmem:[#allocation2 + $0x10] sm:$0x1] %v1411_v22 }
 0x14f   : > { %1418 = vst [vmem:[#allocation2 + $0x8] sm:$0xff] %v1412_v23 }
 0x150 PF: > { %vm1429_vm4 = vcmask 1040384   ;;  %v3867_v28 = vld [vmem:[%s4271_s6 + $0x4] ss:$12 sps:$4 sm:$0xff]   ;;  %v3869_v29 = vld [vmem:[%s4271_s6] ss:$12 sps:$4 sm:$0xff]   ;;  %v4095_v61 = vmov 0   ;;  %s4879_s10 = scalar_lea.vmem %s4812_s11, %s4249_s5  ;;  %s4880_s25 = scalar_lea.vmem %s4813_s12, %s4249_s5 }
 0x151   : > { %v3870_v30 = vld [vmem:[%s4271_s6 + $0x8] ss:$12 sps:$4 sm:$0xff]   ;;  %1659 = vmatprep.subr.bf16.mxu0 %v3867_v28  ;;  %v3873_v45 = vld [vmem:[%s4271_s6 + $0x18] ss:$12 sps:$4 sm:$0xff]   ;;  %v3874_v46 = vld [vmem:[%s4271_s6 + $0x20] ss:$12 sps:$4 sm:$0xff]   ;;  %1691 = vmatprep.mubr.bf16.mxu0 %v4095_v61  ;;  %s4881_s15 = scalar_lea.vmem %s4814_s13, %s4249_s5 }
 0x152   : > { %v3871_v31 = vld [vmem:[%s4271_s6 + $0x1c] ss:$12 sps:$4 sm:$0xff]   ;;  %3700 = vmatprep.subr.bf16.mxu1 %v3870_v30  ;;  %1660 = vmatpush1.bf16.msra.mxu0 %v3869_v29  ;;  %v3875_v47 = vld [vmem:[%s4271_s6 + $0x34] ss:$12 sps:$4 sm:$0xff]   ;;  %v3878_v49 = vld [vmem:[%s4271_s6 + $0x38] ss:$12 sps:$4 sm:$0xff]  }
 0x153   : > { %3701 = vmatpush3.bf16.msra.mxu1 %v3870_v30  ;;  %1661 = vmatprep.subr.bf16.mxu0 %v3871_v31  ;;  %v3877_v48 = vld [vmem:[%s4271_s6 + $0x30] ss:$12 sps:$4 sm:$0xff]   ;;  %v3879_v50 = vld [vmem:[%s4271_s6 + $0x4c] ss:$12 sps:$4 sm:$0xff]   ;;  %v3881_v51 = vld [vmem:[%s4271_s6 + $0x48] ss:$12 sps:$4 sm:$0xff]   ;;  %v1516_v30 = vlaneseq }
 0x154   : > { %v4468_v24 = vld [vmem:[#allocation2] sm:$0xff]  ;;  %3702 = vmatprep.subr.bf16.mxu1 %v3874_v46  ;;  %v3882_v52 = vld [vmem:[%s4271_s6 + $0x50] ss:$12 sps:$4 sm:$0xff]   ;;  %v3886_v55 = vld [vmem:[%s4271_s6 + $0x68] ss:$12 sps:$4 sm:$0xff]   ;;  %s4875_s17 = sld [smem:[#allocation15_spill]] }
 0x155   : > { %v4470_v25 = vld [vmem:[#allocation2 + $0x10] sm:$0x1]  ;;  %1425 = vadd.xlane.f32.xlu0 %v4468_v24  ;;  %v3885_v54 = vld [vmem:[%s4271_s6 + $0x60] ss:$12 sps:$4 sm:$0xff]   ;;  %v3887_v56 = vld [vmem:[%s4271_s6 + $0x7c] ss:$12 sps:$4 sm:$0xff]  }
 0x156   : > { %v4472_v26 = vld [vmem:[#allocation2 + $0x8] sm:$0xff]  ;;  %v1430_v27 = vsel %vm1429_vm4, %v4470_v25, 0.0  ;;  %1662 = vmatpush1.bf16.msra.mxu0 %v3873_v45  ;;  %v3883_v53 = vld [vmem:[%s4271_s6 + $0x64] ss:$12 sps:$4 sm:$0xff]   ;;  %v3891_v59 = vld [vmem:[%s4271_s6 + $0x94] ss:$12 sps:$4 sm:$0xff]  }
 0x157   : > { %1431 = vadd.xlane.f32.xlu1 %v1430_v27  ;;  %3703 = vmatpush3.bf16.msra.mxu1 %v3874_v46  ;;  %v3890_v57 = vld [vmem:[%s4271_s6 + $0x80] ss:$12 sps:$4 sm:$0xff]   ;;  %v3889_v58 = vld [vmem:[%s4271_s6 + $0x78] ss:$12 sps:$4 sm:$0xff]   ;;  %v3893_v62 = vld [vmem:[%s4271_s6 + $0x90] ss:$12 sps:$4 sm:$0xff]  }
 0x158   : > { %1663 = vmatprep.subr.bf16.mxu0 %v3875_v47  ;;  %3704 = vmatprep.subr.bf16.mxu1 %v3878_v49  ;;  %v3894_v60 = vld [vmem:[%s4271_s6 + $0x98] ss:$12 sps:$4 sm:$0xff]   ;;  %v3898_v0 = vld [vmem:[%s4271_s6 + $0xb0] ss:$12 sps:$4 sm:$0xff]   ;;  %v3897_v1 = vld [vmem:[%s4271_s6 + $0xa8] ss:$12 sps:$4 sm:$0xff]  }
 0x159   : > { %1427 = vadd.xlane.f32.xlu0 %v4472_v26  ;;  %v3895_v63 = vld [vmem:[%s4271_s6 + $0xac] ss:$12 sps:$4 sm:$0xff]   ;;  %s4877_s4 = sld [smem:[#allocation16_spill]]  ;;  %v4533_v31 = vshrl.u32 %v1516_v30, 7  ;;  %vm1762_vm5 = vcmask 523264   ;;  %vm1823_vm6 = vcmask 138240  }
 0x15a   : > { %1664 = vmatpush1.bf16.msra.mxu0 %v3877_v48  ;;  %s4876_s1 = scalar_lea.vmem %s4875_s17, %s4249_s5  ;;  %vm1830_vm7 = vcmask 131072   ;;  %s4882_s6 = sld [smem:[#allocation20_spill]] }
 0x15b   : > { %3705 = vmatpush3.bf16.msra.mxu1 %v3878_v49  ;;  %1665 = vmatprep.subr.bf16.mxu0 %v3879_v50  ;;  %v3422_v13 = vld [vmem:[%s4876_s1] ss:$0 sm:$0xff] }
 0x15c   : > { %3706 = vmatprep.subr.bf16.mxu1 %v3882_v52 }
 0x15e   : > { %1666 = vmatpush1.bf16.msra.mxu0 %v3881_v51 }
 0x15f   : > { %3707 = vmatpush3.bf16.msra.mxu1 %v3882_v52  ;;  %1667 = vmatprep.subr.bf16.mxu0 %v3883_v53  ;;  %s4878_s21 = scalar_lea.vmem %s4877_s4, %s4249_s5 }
 0x160   : > { %3708 = vmatprep.subr.bf16.mxu1 %v3886_v55  ;;  %v3423_v19 = vld [vmem:[%s4878_s21] ss:$0 sm:$0xff]  ;;  %s4883_s28 = scalar_lea.vmem %s4882_s6, %s4249_s5 }
 0x162   : > { %1668 = vmatpush1.bf16.msra.mxu0 %v3885_v54 }
 0x163   : > { %3709 = vmatpush3.bf16.msra.mxu1 %v3886_v55  ;;  %1669 = vmatprep.subr.bf16.mxu0 %v3887_v56 }
 0x164   : > { %3710 = vmatprep.subr.bf16.mxu1 %v3890_v57 }
 0x166   : > { %1670 = vmatpush1.bf16.msra.mxu0 %v3889_v58 }
 0x167   : > { %3711 = vmatpush3.bf16.msra.mxu1 %v3890_v57  ;;  %1671 = vmatprep.subr.bf16.mxu0 %v3891_v59 }
 0x168   : > { %3712 = vmatprep.subr.bf16.mxu1 %v3894_v60 }
 0x16a   : > { %1672 = vmatpush1.bf16.msra.mxu0 %v3893_v62 }
 0x16b   : > { %3713 = vmatpush3.bf16.msra.mxu1 %v3894_v60  ;;  %1673 = vmatprep.subr.bf16.mxu0 %v3895_v63 }
 0x16c   : > { %3714 = vmatprep.subr.bf16.mxu1 %v3898_v0 }
 0x16e   : > { %1674 = vmatpush1.bf16.msra.mxu0 %v3897_v1 }
 0x16f   : > { %3715 = vmatpush3.bf16.msra.mxu1 %v3898_v0 }
 0x1e2   : > { %v1426_v32 = vpop.xlane.xlu0 %1425 }
 0x1e3   : > { %v1434_v33 = vmul.f32 0.0078125, %v1426_v32  ;;  %v1518_v32 = vsub.s32 0, %v4533_v31 }
 0x1e4   : > { %v1432_v34 = vpop.xlane.xlu1 %1431 }
 0x1e5   : > { %v1436_v35 = vmul.f32 0.0078125, %v1432_v34  ;;  %v4483_v36 = vsub.f32 %v4468_v24, %v1434_v33  ;;  %v1514_v33 = vld [vmem:[%s4281_s30] sm:$0x7]  ;;  %v1522_v34 = vsub.s32 1, %v4533_v31  ;;  %s4096_s30 = smov 64  }
 0x1e6   : > { %v1428_v38 = vpop.xlane.xlu0 %1427 }
 0x1e7   : > { %v4486_v37 = vsub.f32 %v4470_v25, %v1436_v35  ;;  %v1435_v39 = vmul.f32 0.0078125, %v1428_v38  ;;  %v1440_v40 = vmul.f32 %v4483_v36, %v4483_v36  ;;  %v1526_v35 = vsub.s32 2, %v4533_v31 }
 0x1e8   : > { %v1523_v38 = vrot.slane %v1514_v33, %v1522_v34 }
 0x1e9   : > { %v1442_v41 = vmul.f32 %v4486_v37, %v4486_v37  ;;  %v4493_v42 = vsub.f32 %v4472_v26, %v1435_v39  ;;  %1443 = vadd.xlane.f32.xlu1 %v1440_v40  ;;  %v1527_v40 = vrot.slane %v1514_v33, %v1526_v35 }
 0x1eb   : > { %v1447_v43 = vsel %vm1429_vm4, %v1442_v41, 0.0  ;;  %v1441_v44 = vmul.f32 %v4493_v42, %v4493_v42 }
 0x1ed   : > { %1448 = vadd.xlane.f32.xlu1 %v1447_v43  ;;  %1445 = vadd.xlane.f32.xlu0 %v1441_v44 }
 0x276   : > { %v1444_v2 = vpop.xlane.xlu1 %1443 }
 0x277   : > { %v1450_v3 = vmul.f32 0.0078125, %v1444_v2 }
 0x279   : > { %v1453_v4 = vadd.f32 1e-06, %v1450_v3 }
 0x27a   : > { %v1449_v5 = vpop.xlane.xlu1 %1448  ;;  %v1446_v6 = vpop.xlane.xlu0 %1445 }
 0x27b   : > { %3987 = vrsqrt.f32 %v1453_v4  ;;  %v1452_v7 = vmul.f32 0.0078125, %v1449_v5  ;;  %v1451_v8 = vmul.f32 0.0078125, %v1446_v6  ;;  %v4557_v4 = vsel %vm1429_vm4, 65535, %v4095_v61 }
 0x27d   : > { %v1455_v9 = vadd.f32 1e-06, %v1452_v7  ;;  %v1454_v10 = vadd.f32 1e-06, %v1451_v8 }
 0x27f   : > { %3989 = vrsqrt.f32 %v1455_v9 }
 0x280   : > { %3991 = vrsqrt.f32 %v1454_v10 }
 0x285   : > { %v3988_v11 = vpop.eup %3987 }
 0x286   : > { %v1459_v12 = vmul.f32 %v3988_v11, %v4483_v36  ;;  %v1519_v36 = vrot.slane %v1514_v33, %v1518_v32 }
 0x288   : > { %v1468_v18 = vmul.f32 %v3422_v13, %v1459_v12 }
 0x289   : > { %v3990_v14 = vpop.eup %3989 }
 0x28a   : > { %v3992_v15 = vpop.eup %3991  ;;  %v1461_v16 = vmul.f32 %v3990_v14, %v4486_v37  ;;  %v1477_v23 = vadd.f32 %v3423_v19, %v1468_v18 }
 0x28b   : > { %v1460_v17 = vmul.f32 %v3992_v15, %v4493_v42 }
 0x28c   : > { %v1470_v20 = vmul.f32 %v3422_v13, %v1461_v16 }
 0x28d   : > { %v1469_v21 = vmul.f32 %v3422_v13, %v1460_v17 }
 0x28e   : > { %v1479_v22 = vadd.f32 %v3423_v19, %v1470_v20 }
 0x28f   : > { %v1478_v27 = vadd.f32 %v3423_v19, %v1469_v21 }
 0x290   : > { %v1481_v28 = vpack.c.bf16 %v1479_v22, %v1479_v22 }
 0x291   : > { %v1480_v29 = vpack.c.bf16 %v1478_v27, %v1477_v23 }
 0x293   : > { %1692 = vmatmul.mubr.bf16.vlgmr.msra.gmra.mrb[0].mxu0 %v1480_v29  ;;  %3716 = vmatprep.mubr.bf16.mxu1 %v1480_v29 }
 0x294   : > { %3717 = vmatmul.mubr.bf16.vlgmr.msra.gmra.mrb[0].mxu1 %v1481_v28  ;;  %1701 = vmatprep.mubr.bf16.mxu0 %v4095_v61 }
 0x29b   : > { %1702 = vmatmul.mubr.bf16.gmra.mrb[4].mxu0 %v1481_v28 }
 0x366   : > { %v1693_v37 = vpop.f32.mrb[0].mxu0 }
 0x367   : > { %v1695_v39 = vpop.f32.mrb[1].mxu0  ;;  %v3718_v41 = vpop.f32.mrb[0].mxu1  ;;  %v1694_v44 = vadd.f32 %v1693_v37, %v1519_v36 }
 0x368   : > { %v1697_v42 = vpop.f32.mrb[2].mxu0  ;;  %v1744_v43 = vpop.f32.mrb[1].mxu1  ;;  %v1696_v48 = vadd.f32 %v1695_v39, %v1523_v38  ;;  %v1753_v0 = vadd.f32 %v3718_v41, %v1527_v40 }
 0x369   : > { %v1698_v45 = vadd.f32 %v1697_v42, %v1519_v36  ;;  %v1699_v46 = vpop.f32.mrb[3].mxu0  ;;  %v3719_v47 = vpop.f32.mrb[2].mxu1  ;;  %v1745_v52 = vadd.f32 %v1744_v43, %v1527_v40 }
 0x36a   : > { %v1700_v49 = vadd.f32 %v1699_v46, %v1523_v38  ;;  %v1747_v50 = vpop.f32.mrb[3].mxu1  ;;  %v4553_v3 = vpack.c.bf16 %v1753_v0, %v1753_v0 }
 0x36b   : > { %v1758_v51 = vpack.c.bf16 %v1698_v45, %v1694_v44  ;;  %v1748_v53 = vadd.f32 %v1747_v50, %v1527_v40 }
 0x36c   : > { %v1760_v54 = vpack.c.bf16 %v1700_v49, %v1696_v48  ;;  %v1865_v6 = vand.u32 %v4557_v4, %v4553_v3 }
 0x36d   : > { %v4545_v55 = vpack.c.bf16 %v1748_v53, %v1745_v52  ;;  %3724 = vmatprep.mubr.msk.bf16.mxu1 %vm1762_vm5, %v1758_v51 }
 0x36e   : > { %v1703_v56 = vpop.f32.mrb[4].mxu0  ;;  %3772 = vmatprep.subr.msk.bf16.mxu1 %vm1762_vm5, %v1760_v54  ;;  %v1770_v57 = vsel %vm1762_vm5, %v1760_v54, 0 }
 0x36f   : > { %v1705_v58 = vpop.f32.mrb[5].mxu0  ;;  %3721 = vmatpush3.bf16.xpose.msra.mxu1 %v1770_v57  ;;  %v1704_v2 = vadd.f32 %v1703_v56, %v1519_v36 }
 0x370   : > { %v1706_v59 = vadd.f32 %v1705_v58, %v1523_v38  ;;  %v1707_v60 = vpop.f32.mrb[6].mxu0 }
 0x371   : > { %v1708_v62 = vpop.f32.mrb[7].mxu0  ;;  %v1759_v5 = vpack.c.bf16 %v1704_v2, %v1704_v2 }
 0x372   : > { %v1761_v63 = vpack.c.bf16 %v1706_v59, %v1706_v59 }
 0x374   : > { %3773 = vmatprep.subr.msk.bf16.mxu1 %vm1762_vm5, %v1761_v63  ;;  %v1773_v1 = vsel %vm1762_vm5, %v1761_v63, 0 }
 0x377   : > { %3723 = vmatpush3.bf16.xpose.msra.mxu1 %v1773_v1 }
 0x378   : > { %3728 = vmatprep.subr.bf16.mxu1 %v4545_v55 }
 0x37e   : > { %3725 = vmatmul.mubr.msk.bf16.vlgmr.msra.gmra.mrb[4].mxu1 %vm1762_vm5, %v1759_v5 }
 0x37f   : > { %3729 = vmatpush3.bf16.msra.mxu1 %v4545_v55 }
 0x380   : > { %3730 = vmatprep.subr.bf16.mxu1 %v1865_v6 }
 0x383   : > { %3731 = vmatpush3.bf16.msra.mxu1 %v1865_v6 }
 0x451   : > { %v3726_v7 = vpop.f32.mrb[4].mxu1 }
 0x452   : > { %v1809_v8 = vpop.f32.mrb[5].mxu1  ;;  %v1831_v13 = vsel %vm1830_vm7, %v3726_v7, -inf }
 0x453   : > { %v3727_v9 = vpop.f32.mrb[6].mxu1  ;;  %v1824_v10 = vsel %vm1823_vm6, %v1809_v8, -inf }
 0x454   : > { %1825 = vmax.xlane.f32.xlu0 %v1824_v10  ;;  %v1812_v11 = vpop.f32.mrb[7].mxu1 }
 0x455   : > { %v1827_v12 = vsel %vm1823_vm6, %v1812_v11, -inf }
 0x456   : > { %1828 = vmax.xlane.f32.xlu1 %v1827_v12  ;;  %v3899_v12 = vld [vmem:[%s4276_s23] sm:$0xff]  }
 0x458   : > { %1832 = vmax.xlane.f32.xlu0 %v1831_v13  ;;  %v3900_v13 = vld [vmem:[%s4276_s23 + $0x8] sm:$0xff]  }
 0x467   : > { %1929 = vrot.lane.b32.xlu1 %v1760_v54, %s4096_s30 }
 0x46b   : > { %1923 = vrot.lane.b32.xlu1 %v1758_v51, %s4096_s30 }
 0x46e   : > { %1931 = vrot.lane.b32.xlu0 %v1761_v63, %s4096_s30 }
 0x46f   : > { %1925 = vrot.lane.b32.xlu1 %v1759_v5, %s4096_s30 }
 0x4e1   : > { %v1826_v14 = vpop.xlane.xlu0 %1825 }
 0x4e2   : > { %v1834_v15 = vsub.f32 %v1809_v8, %v1826_v14  ;;  %v3901_v14 = vld [vmem:[%s4276_s23 + $0x10] sm:$0xff]  }
 0x4e3   : > { %v1829_v16 = vpop.xlane.xlu1 %1828 }
 0x4e4   : > { %v1837_v17 = vmul.f32 1.442695, %v1834_v15  ;;  %v1835_v18 = vsub.f32 %v1812_v11, %v1829_v16  ;;  %v3902_v15 = vld [vmem:[%s4276_s23 + $0x18] sm:$0xff]   ;;  %v3903_v16 = vld [vmem:[%s4276_s23 + $0x20] sm:$0xff]  }
 0x4e5   : > { %v1833_v19 = vpop.xlane.xlu0 %1832 }
 0x4e6   : > { %v1839_v20 = vmul.f32 1.442695, %v1835_v18  ;;  %v1836_v21 = vsub.f32 %v3726_v7, %v1833_v19  ;;  %3993 = vpow2.f32 %v1837_v17  ;;  %v3904_v17 = vld [vmem:[%s4276_s23 + $0x28] sm:$0xff]  }
 0x4e7   : > { %v1930_v22 = vpop.permute.xlu1 %1929 }
 0x4e8   : > { %3995 = vpow2.f32 %v1839_v20  ;;  %v1841_v23 = vmul.f32 1.442695, %v1836_v21  ;;  %3774 = vmatprep.subr.msk.bf16.mxu1 %vm1762_vm5, %v1930_v22  ;;  %v1940_v36 = vsel %vm1762_vm5, %v1930_v22, 0  ;;  %v3905_v21 = vld [vmem:[%s4276_s23 + $0x30] sm:$0xff]   ;;  %v3906_v22 = vld [vmem:[%s4276_s23 + $0x38] sm:$0xff]  }
 0x4e9   : > { %v1932_v38 = vpop.permute.xlu0 %1931 }
 0x4ea   : > { %3997 = vpow2.f32 %v1841_v23  ;;  %v1943_v39 = vsel %vm1762_vm5, %v1932_v38, 0 }
 0x4eb   : > { %v1924_v37 = vpop.permute.xlu1 %1923 }
 0x4ef   : > { %v1926_v40 = vpop.permute.xlu1 %1925 }
 0x4f0   : > { %v3994_v27 = vpop.eup %3993 }
 0x4f2   : > { %v4571_v28 = vpop.eup %3995 }
 0x4f3   : > { %v1852_v29 = vpack.c.bf16 %v4571_v28, %v3994_v27  ;;  %v1846_v11 = vsel %vm1823_vm6, %v4571_v28, 0.0 }
 0x4f4   : > { %v4574_v30 = vpop.eup %3997 }
 0x4f5   : > { %3732 = vmatprep.mubr.msk.bf16.mxu1 %vm1823_vm6, %v1852_v29  ;;  %v1853_v33 = vpack.c.bf16 %v4574_v30, %v4574_v30  ;;  %v1849_v10 = vsel %vm1830_vm7, %v4574_v30, 0.0 }
 0x4f7   : > { %3733 = vmatmul.mubr.msk.bf16.vlgmr.msra.gmra.mrb[8].mxu1 %vm1823_vm6, %v1853_v33 }
 0x4f8   : > { %3737 = vmatpush3.bf16.xpose.msra.mxu1 %v1940_v36  ;;  %3740 = vmatprep.mubr.msk.bf16.mxu1 %vm1762_vm5, %v1924_v37 }
 0x4f9   : > { %3775 = vmatprep.subr.msk.bf16.mxu1 %vm1762_vm5, %v1932_v38 }
 0x500   : > { %3739 = vmatpush3.bf16.xpose.msra.mxu1 %v1943_v39 }
 0x507   : > { %3741 = vmatmul.mubr.msk.bf16.vlgmr.msra.gmra.mrb[12].mxu1 %vm1762_vm5, %v1926_v40 }
 0x508   : > { %2544 = vmatprep.mubr.bf16.mxu1 %v4095_v61 }
 0x5ca   : > { %v4586_v41 = vpop.f32.mrb[8].mxu1 }
 0x5cb   : > { %v4588_v42 = vpop.f32.mrb[9].mxu1 }
 0x5cc   : > { %v3735_v43 = vpop.f32.mrb[10].mxu1 }
 0x5cd   : > { %v4590_v44 = vpop.f32.mrb[11].mxu1 }
 0x5da   : > { %v3742_v45 = vpop.f32.mrb[12].mxu1 }
 0x5db   : > { %v1979_v46 = vpop.f32.mrb[13].mxu1  ;;  %v1999_v47 = vsel %vm1830_vm7, %v3742_v45, -inf }
 0x5dc   : > { %2000 = vmax.xlane.f32.xlu0 %v1999_v47  ;;  %v3743_v48 = vpop.f32.mrb[14].mxu1  ;;  %v1993_v49 = vsel %vm1823_vm6, %v1979_v46, -inf }
 0x5dd   : > { %1994 = vmax.xlane.f32.xlu1 %v1993_v49  ;;  %v1982_v50 = vpop.f32.mrb[15].mxu1 }
 0x5de   : > { %v1996_v51 = vsel %vm1823_vm6, %v1982_v50, -inf }
 0x5e0   : > { %1997 = vmax.xlane.f32.xlu0 %v1996_v51 }
 0x5ee   : > { %2026 = vrot.lane.b32.xlu1 %v4553_v3, %s4096_s30 }
 0x5f6   : > { %2024 = vrot.lane.b32.xlu0 %v4545_v55, %s4096_s30 }
 0x669   : > { %v2001_v52 = vpop.xlane.xlu0 %2000 }
 0x66a   : > { %v2004_v53 = vsub.f32 %v3742_v45, %v2001_v52  ;;  %v1995_v54 = vpop.xlane.xlu1 %1994 }
 0x66b   : > { %v2002_v56 = vsub.f32 %v1979_v46, %v1995_v54 }
 0x66c   : > { %v2009_v57 = vmul.f32 1.442695, %v2004_v53 }
 0x66d   : > { %v2005_v58 = vmul.f32 1.442695, %v2002_v56  ;;  %v1998_v59 = vpop.xlane.xlu0 %1997 }
 0x66e   : > { %v2003_v60 = vsub.f32 %v1982_v50, %v1998_v59  ;;  %v2027_v62 = vpop.permute.xlu1 %2026 }
 0x66f   : > { %3999 = vpow2.f32 %v2005_v58  ;;  %v2036_v1 = vand.u32 %v2027_v62, %v4557_v4  ;;  %v1843_v4 = vsel %vm1823_vm6, %v3994_v27, 0.0 }
 0x670   : > { %v2007_v63 = vmul.f32 1.442695, %v2003_v60  ;;  %4001 = vpow2.f32 %v2009_v57 }
 0x671   : > { %v2025_v0 = vpop.permute.xlu0 %2024 }
 0x672   : > { %4003 = vpow2.f32 %v2007_v63  ;;  %3744 = vmatprep.subr.bf16.mxu0 %v2025_v0 }
 0x673   : > { %3745 = vmatpush3.bf16.msra.mxu0 %v2025_v0 }
 0x674   : > { %3746 = vmatprep.subr.bf16.mxu0 %v2036_v1 }
 0x677   : > { %3747 = vmatpush3.bf16.msra.mxu0 %v2036_v1 }
 0x678   : > { %3752 = vmatprep.subr.bf16.mxu0 %v3899_v12 }
 0x679   : > { %v4000_v55 = vpop.eup %3999 }
 0x67a   : > { %v2011_v2 = vsel %vm1823_vm6, %v4000_v55, 0.0  ;;  %v4002_v3 = vpop.eup %4001 }
 0x67b   : > { %2012 = vadd.xlane.f32.xlu1 %v2011_v2  ;;  %v2021_v8 = vpack.c.bf16 %v4002_v3, %v4002_v3  ;;  %v2017_v9 = vsel %vm1830_vm7, %v4002_v3, 0.0 }
 0x67c   : > { %v4004_v5 = vpop.eup %4003 }
 0x67d   : > { %v2014_v6 = vsel %vm1823_vm6, %v4004_v5, 0.0  ;;  %v2020_v7 = vpack.c.bf16 %v4004_v5, %v4000_v55 }
 0x67e   : > { %2015 = vadd.xlane.f32.xlu0 %v2014_v6 }
 0x67f   : > { %1844 = vadd.xlane.f32.xlu1 %v1843_v4  ;;  %3748 = vmatprep.mubr.msk.bf16.mxu0 %vm1823_vm6, %v2020_v7 }
 0x680   : > { %3749 = vmatmul.mubr.msk.bf16.vlgmr.msra.gmra.mrb[8].mxu0 %vm1823_vm6, %v2021_v8 }
 0x681   : > { %3753 = vmatpush3.bf16.msra.mxu0 %v3899_v12  ;;  %v3907_v12 = vld [vmem:[%s4303_s29] ss:$16 sps:$4 sm:$0xff]  }
 0x682   : > { %2018 = vadd.xlane.f32.xlu0 %v2017_v9  ;;  %3754 = vmatprep.subr.bf16.mxu0 %v3900_v13 }
 0x683   : > { %1850 = vadd.xlane.f32.xlu1 %v1849_v10 }
 0x685   : > { %3755 = vmatpush3.bf16.msra.mxu0 %v3900_v13  ;;  %v3909_v13 = vld [vmem:[%s4303_s29 + $0x4] ss:$16 sps:$4 sm:$0xff]  }
 0x686   : > { %1847 = vadd.xlane.f32.xlu0 %v1846_v11  ;;  %3756 = vmatprep.subr.bf16.mxu0 %v3901_v14 }
 0x687   : > { %2512 = vmatprep.subr.bf16.mxu1 %v3909_v13  ;;  %v3466_v13 = vld [vmem:[%s4881_s15] ss:$0 sm:$0xff] }
 0x688   : > { %2513 = vmatpush1.bf16.msra.mxu1 %v3907_v12 }
 0x689   : > { %3757 = vmatpush3.bf16.msra.mxu0 %v3901_v14  ;;  %v3912_v14 = vld [vmem:[%s4303_s29 + $0xc] ss:$16 sps:$4 sm:$0xff]  }
 0x68a   : > { %3758 = vmatprep.subr.bf16.mxu0 %v3902_v15 }
 0x68d   : > { %3759 = vmatpush3.bf16.msra.mxu0 %v3902_v15  ;;  %v3915_v15 = vld [vmem:[%s4303_s29 + $0x24] ss:$16 sps:$4 sm:$0xff]  }
 0x68e   : > { %3760 = vmatprep.subr.bf16.mxu0 %v3903_v16  ;;  %2514 = vmatprep.subr.bf16.mxu1 %v3915_v15 }
 0x691   : > { %3761 = vmatpush3.bf16.msra.mxu0 %v3903_v16  ;;  %v3918_v16 = vld [vmem:[%s4303_s29 + $0x2c] ss:$16 sps:$4 sm:$0xff]  }
 0x692   : > { %3762 = vmatprep.subr.bf16.mxu0 %v3904_v17 }
 0x695   : > { %3763 = vmatpush3.bf16.msra.mxu0 %v3904_v17 }
 0x696   : > { %3764 = vmatprep.subr.bf16.mxu0 %v3905_v21 }
 0x699   : > { %3765 = vmatpush3.bf16.msra.mxu0 %v3905_v21 }
 0x69a   : > { %3766 = vmatprep.subr.bf16.mxu0 %v3906_v22 }
 0x69d   : > { %3767 = vmatpush3.bf16.msra.mxu0 %v3906_v22 }
 0x69e   : > { %2563 = vmatprep.subr.bf16.mxu0 %v3912_v14 }
 0x708   : > { %v2013_v20 = vpop.xlane.xlu1 %2012 }
 0x70b   : > { %v2016_v18 = vpop.xlane.xlu0 %2015 }
 0x70c   : > { %v1845_v43 = vpop.xlane.xlu1 %1844 }
 0x70f   : > { %v2019_v19 = vpop.xlane.xlu0 %2018 }
 0x710   : > { %4005 = vrcp.f32 %v2019_v19  ;;  %v1851_v45 = vpop.xlane.xlu1 %1850 }
 0x711   : > { %4007 = vrcp.f32 %v2013_v20 }
 0x712   : > { %4009 = vrcp.f32 %v2016_v18 }
 0x713   : > { %v1848_v46 = vpop.xlane.xlu0 %1847  ;;  %4011 = vrcp.f32 %v1845_v43  ;;  %v3927_v43 = vld [vmem:[%s4303_s29 + $0x64] ss:$16 sps:$4 sm:$0xff]  }
 0x714   : > { %4013 = vrcp.f32 %v1851_v45  ;;  %v3930_v45 = vld [vmem:[%s4303_s29 + $0x6c] ss:$16 sps:$4 sm:$0xff]  }
 0x715   : > { %4015 = vrcp.f32 %v1848_v46  ;;  %v3925_v46 = vld [vmem:[%s4303_s29 + $0x60] ss:$16 sps:$4 sm:$0xff]  }
 0x71a   : > { %v4006_v23 = vpop.eup %4005 }
 0x71b   : > { %v4008_v30 = vpop.eup %4007 }
 0x71c   : > { %v4010_v36 = vpop.eup %4009 }
 0x71d   : > { %v4012_v47 = vpop.eup %4011 }
 0x71e   : > { %v4014_v48 = vpop.eup %4013  ;;  %v1918_v56 = vmul.f32 %v4012_v47, %v4588_v42  ;;  %v3928_v47 = vld [vmem:[%s4303_s29 + $0x68] ss:$16 sps:$4 sm:$0xff]  }
 0x71f   : > { %v4016_v49 = vpop.eup %4015  ;;  %v1920_v51 = vmul.f32 %v4014_v48, %v4586_v41  ;;  %v3456_v41 = vld [vmem:[%s4879_s10] ss:$0 sm:$0xff]  ;;  %v3933_v48 = vld [vmem:[%s4303_s29 + $0x84] ss:$16 sps:$4 sm:$0xff]  }
 0x720   : > { %v1919_v57 = vmul.f32 %v4016_v49, %v4590_v44  ;;  %v3465_v44 = vld [vmem:[%s4880_s25] ss:$0 sm:$0xff]  ;;  %v3936_v49 = vld [vmem:[%s4303_s29 + $0x8c] ss:$16 sps:$4 sm:$0xff]  }
 0x753   : > { %v3750_v27 = vpop.f32.mrb[8].mxu0 }
 0x754   : > { %v2091_v28 = vmul.f32 %v4006_v23, %v3750_v27  ;;  %v2072_v29 = vpop.f32.mrb[9].mxu0 }
 0x755   : > { %v3751_v33 = vpop.f32.mrb[10].mxu0  ;;  %v2089_v38 = vmul.f32 %v4008_v30, %v2072_v29 }
 0x756   : > { %v2075_v37 = vpop.f32.mrb[11].mxu0  ;;  %2099 = vrot.lane.b32.xlu1 %v2091_v28, %s4096_s30 }
 0x757   : > { %v2090_v39 = vmul.f32 %v4010_v36, %v2075_v37  ;;  %v3921_v37 = vld [vmem:[%s4303_s29 + $0x44] ss:$16 sps:$4 sm:$0xff]  }
 0x759   : > { %v3862_v40 = vpack.i.bf16 %v2090_v39, %v2089_v38  ;;  %v3924_v38 = vld [vmem:[%s4303_s29 + $0x4c] ss:$16 sps:$4 sm:$0xff]   ;;  %v3919_v39 = vld [vmem:[%s4303_s29 + $0x40] ss:$16 sps:$4 sm:$0xff]  }
 0x75b   : > { %3863 = vrot.lane.b32.xlu0 %v3862_v40, %s4096_s30  ;;  %v3922_v40 = vld [vmem:[%s4303_s29 + $0x48] ss:$16 sps:$4 sm:$0xff]  }
 0x7c8   : > { %v2100_v50 = vpop.permute.xlu1 %2099 }
 0x7c9   : > { %v2106_v58 = vsel %vm1762_vm5, %v1920_v51, %v2100_v50  ;;  %v3931_v50 = vld [vmem:[%s4303_s29 + $0x80] ss:$16 sps:$4 sm:$0xff]   ;;  %v3934_v51 = vld [vmem:[%s4303_s29 + $0x88] ss:$16 sps:$4 sm:$0xff]  }
 0x7ca   : > { %v2108_v63 = vpack.c.bf16 %v2106_v58, %v2106_v58  ;;  %v3948_v58 = vld [vmem:[%s4303_s29 + $0xcc] ss:$16 sps:$4 sm:$0xff]  }
 0x7cd   : > { %v3864_v52 = vpop.permute.xlu0 %3863 }
 0x7ce   : > { %v3866_v53 = vunpack.i.h.bf16 %v3864_v52  ;;  %v3865_v54 = vunpack.i.l.bf16 %v3864_v52  ;;  %v3939_v52 = vld [vmem:[%s4303_s29 + $0xa4] ss:$16 sps:$4 sm:$0xff]  }
 0x7d0   : > { %v2104_v59 = vsel %vm1762_vm5, %v1918_v56, %v3865_v54  ;;  %v2105_v60 = vsel %vm1762_vm5, %v1919_v57, %v3866_v53  ;;  %v3942_v53 = vld [vmem:[%s4303_s29 + $0xac] ss:$16 sps:$4 sm:$0xff]   ;;  %v3937_v54 = vld [vmem:[%s4303_s29 + $0xa0] ss:$16 sps:$4 sm:$0xff]   ;;  %v3940_v56 = vld [vmem:[%s4303_s29 + $0xa8] ss:$16 sps:$4 sm:$0xff]  }
 0x7d1   : > { %v2107_v62 = vpack.c.bf16 %v2105_v60, %v2104_v59  ;;  %v3945_v57 = vld [vmem:[%s4303_s29 + $0xc4] ss:$16 sps:$4 sm:$0xff]   ;;  %v3943_v59 = vld [vmem:[%s4303_s29 + $0xc0] ss:$16 sps:$4 sm:$0xff]   ;;  %v3946_v60 = vld [vmem:[%s4303_s29 + $0xc8] ss:$16 sps:$4 sm:$0xff]  }
 0x7d3   : > { %3768 = vmatprep.mubr.bf16.mxu0 %v2107_v62  ;;  %v3951_v62 = vld [vmem:[%s4303_s29 + $0xe4] ss:$16 sps:$4 sm:$0xff]  }
 0x7d4   : > { %3769 = vmatmul.mubr.bf16.vlgmr.msra.gmra.mrb[12].mxu0 %v2108_v63  ;;  %v3949_v63 = vld [vmem:[%s4303_s29 + $0xe0] ss:$16 sps:$4 sm:$0xff]  }
 0x7d5   : > { %2595 = vmatprep.mubr.bf16.mxu0 %v4095_v61 }
 0x8a7   : > { %v3770_v42 = vpop.f32.mrb[12].mxu0 }
 0x8a8   : > { %v2223_v0 = vadd.f32 %v3770_v42, %v3456_v41  ;;  %v2214_v1 = vpop.f32.mrb[13].mxu0  ;;  %v3954_v42 = vld [vmem:[%s4303_s29 + $0xec] ss:$16 sps:$4 sm:$0xff]  }
 0x8a9   : > { %v2215_v55 = vadd.f32 %v3456_v41, %v2214_v1  ;;  %v3771_v2 = vpop.f32.mrb[14].mxu0 }
 0x8aa   : > { %v2217_v3 = vpop.f32.mrb[15].mxu0  ;;  %v2237_v7 = vmul.f32 %v3465_v44, %v2223_v0  ;;  %v3955_v0 = vld [vmem:[%s4314_s19 + $0x40] sm:$0xff]  }
 0x8ab   : > { %v2235_v5 = vmul.f32 %v3465_v44, %v2215_v55  ;;  %v2218_v6 = vadd.f32 %v3456_v41, %v2217_v3  ;;  %v3952_v41 = vld [vmem:[%s4303_s29 + $0xe8] ss:$16 sps:$4 sm:$0xff]  }
 0x8ac   : > { %v4645_v10 = vadd.f32 %v2237_v7, %v4470_v25  ;;  %v3916_v25 = vld [vmem:[%s4303_s29 + $0x28] ss:$16 sps:$4 sm:$0xff]  }
 0x8ad   : > { %v2236_v8 = vmul.f32 %v3465_v44, %v2218_v6  ;;  %v4638_v4 = vadd.f32 %v2235_v5, %v4468_v24  ;;  %v3910_v24 = vld [vmem:[%s4303_s29 + $0x8] ss:$16 sps:$4 sm:$0xff]   ;;  %v3956_v44 = vld [vmem:[%s4314_s19 + $0xc0] sm:$0xff]  }
 0x8ae   : > { %v2247_v11 = vsel %vm1429_vm4, %v4645_v10, 0.0  ;;  %2564 = vmatpush1.bf16.msra.mxu0 %v3910_v24 }
 0x8af   : > { %2243 = vadd.xlane.f32.xlu1 %v4638_v4  ;;  %v4642_v9 = vadd.f32 %v2236_v8, %v4472_v26  ;;  %v3913_v26 = vld [vmem:[%s4303_s29 + $0x20] ss:$16 sps:$4 sm:$0xff]   ;;  %2565 = vmatprep.subr.bf16.mxu0 %v3918_v16 }
 0x8b0   : > { %2515 = vmatpush1.bf16.msra.mxu1 %v3913_v26  ;;  %v3467_v26 = vld [vmem:[%s4883_s28] ss:$0 sm:$0xff] }
 0x8b1   : > { %2245 = vadd.xlane.f32.xlu0 %v4642_v9  ;;  %2516 = vmatprep.subr.bf16.mxu1 %v3921_v37 }
 0x8b2   : > { %2566 = vmatpush1.bf16.msra.mxu0 %v3916_v25 }
 0x8b3   : > { %2567 = vmatprep.subr.bf16.mxu0 %v3924_v38  ;;  %v3963_v38 = vld [vmem:[%s4314_s19 + $0x50] sm:$0xff]  }
 0x8b4   : > { %2517 = vmatpush1.bf16.msra.mxu1 %v3919_v39  ;;  %v3965_v39 = vld [vmem:[%s4314_s19 + $0x10] sm:$0xff]  }
 0x8b5   : > { %2248 = vadd.xlane.f32.xlu0 %v2247_v11  ;;  %2518 = vmatprep.subr.bf16.mxu1 %v3927_v43  ;;  %v3967_v43 = vld [vmem:[%s4314_s19 + $0x58] sm:$0xff]  }
 0x8b6   : > { %2568 = vmatpush1.bf16.msra.mxu0 %v3922_v40  ;;  %v3966_v40 = vld [vmem:[%s4314_s19 + $0x90] sm:$0xff]  }
 0x8b7   : > { %2569 = vmatprep.subr.bf16.mxu0 %v3930_v45  ;;  %v3968_v45 = vld [vmem:[%s4314_s19 + $0xd8] sm:$0xff]  }
 0x8b8   : > { %2519 = vmatpush1.bf16.msra.mxu1 %v3925_v46  ;;  %v3969_v46 = vld [vmem:[%s4314_s19 + $0x18] sm:$0xff]  }
 0x8b9   : > { %2520 = vmatprep.subr.bf16.mxu1 %v3933_v48  ;;  %v3971_v48 = vld [vmem:[%s4314_s19 + $0x60] sm:$0xff]  }
 0x8ba   : > { %2570 = vmatpush1.bf16.msra.mxu0 %v3928_v47  ;;  %v3970_v47 = vld [vmem:[%s4314_s19 + $0x98] sm:$0xff]  }
 0x8bb   : > { %2571 = vmatprep.subr.bf16.mxu0 %v3936_v49  ;;  %v3972_v49 = vld [vmem:[%s4314_s19 + $0xe0] sm:$0xff]  }
 0x8bc   : > { %2521 = vmatpush1.bf16.msra.mxu1 %v3931_v50  ;;  %v3973_v50 = vld [vmem:[%s4314_s19 + $0x20] sm:$0xff]  }
 0x8bd   : > { %2522 = vmatprep.subr.bf16.mxu1 %v3939_v52  ;;  %v3975_v52 = vld [vmem:[%s4314_s19 + $0x68] sm:$0xff]  }
 0x8be   : > { %2572 = vmatpush1.bf16.msra.mxu0 %v3934_v51  ;;  %v3974_v51 = vld [vmem:[%s4314_s19 + $0xa0] sm:$0xff]  }
 0x8bf   : > { %2573 = vmatprep.subr.bf16.mxu0 %v3942_v53  ;;  %v3976_v53 = vld [vmem:[%s4314_s19 + $0xe8] sm:$0xff]  }
 0x8c0   : > { %2523 = vmatpush1.bf16.msra.mxu1 %v3937_v54  ;;  %v3977_v54 = vld [vmem:[%s4314_s19 + $0x28] sm:$0xff]  }
 0x8c1   : > { %2524 = vmatprep.subr.bf16.mxu1 %v3945_v57  ;;  %v3979_v57 = vld [vmem:[%s4314_s19 + $0x70] sm:$0xff]  }
 0x8c2   : > { %2574 = vmatpush1.bf16.msra.mxu0 %v3940_v56  ;;  %v3978_v56 = vld [vmem:[%s4314_s19 + $0xa8] sm:$0xff]  }
 0x8c3   : > { %2575 = vmatprep.subr.bf16.mxu0 %v3948_v58  ;;  %v3980_v58 = vld [vmem:[%s4314_s19 + $0xf0] sm:$0xff]  }
 0x8c4   : > { %2525 = vmatpush1.bf16.msra.mxu1 %v3943_v59  ;;  %v3981_v59 = vld [vmem:[%s4314_s19 + $0x30] sm:$0xff]  }
 0x8c5   : > { %2526 = vmatprep.subr.bf16.mxu1 %v3951_v62  ;;  %v3983_v62 = vld [vmem:[%s4314_s19 + $0x78] sm:$0xff]  }
 0x8c6   : > { %2576 = vmatpush1.bf16.msra.mxu0 %v3946_v60  ;;  %v3982_v60 = vld [vmem:[%s4314_s19 + $0xb0] sm:$0xff]  }
 0x8c7   : > { %2577 = vmatprep.subr.bf16.mxu0 %v3954_v42  ;;  %v3986_v42 = vld [vmem:[%s4314_s19 + $0xb8] sm:$0xff]  }
 0x8c8   : > { %2527 = vmatpush1.bf16.msra.mxu1 %v3949_v63  ;;  %v3984_v63 = vld [vmem:[%s4314_s19 + $0xf8] sm:$0xff]  }
 0x8c9   : > { %3630 = vmatprep.subr.bf16.mxu1 %v3955_v0  ;;  %v2330_v0 = vld [vmem:[%s4309_s7] sm:$0xf] }
 0x8ca   : > { %2578 = vmatpush1.bf16.msra.mxu0 %v3952_v41  ;;  %v3985_v41 = vld [vmem:[%s4314_s19 + $0x38] sm:$0xff]  }
 0x8cb   : > { %3658 = vmatprep.subr.bf16.mxu0 %v3956_v44  ;;  %v2346_v44 = vsub.s32 3, %v4533_v31 }
 0x93c   : > { %v2244_v17 = vpop.xlane.xlu1 %2243 }
 0x93d   : > { %v2250_v18 = vmul.f32 0.0078125, %v2244_v17 }
 0x93e   : > { %v2246_v19 = vpop.xlane.xlu0 %2245 }
 0x93f   : > { %v4659_v20 = vsub.f32 %v4638_v4, %v2250_v18  ;;  %v2251_v21 = vmul.f32 0.0078125, %v2246_v19 }
 0x941   : > { %v4662_v22 = vsub.f32 %v4642_v9, %v2251_v21  ;;  %v2256_v23 = vmul.f32 %v4659_v20, %v4659_v20 }
 0x942   : > { %v2249_v27 = vpop.xlane.xlu0 %2248 }
 0x943   : > { %v2252_v28 = vmul.f32 0.0078125, %v2249_v27  ;;  %2259 = vadd.xlane.f32.xlu1 %v2256_v23  ;;  %v2257_v29 = vmul.f32 %v4662_v22, %v4662_v22  ;;  %v3957_v27 = vld [vmem:[%s4314_s19] sm:$0xff]  }
 0x945   : > { %v4669_v30 = vsub.f32 %v4645_v10, %v2252_v28  ;;  %2261 = vadd.xlane.f32.xlu0 %v2257_v29  ;;  %v3959_v29 = vld [vmem:[%s4314_s19 + $0x48] sm:$0xff]  }
 0x947   : > { %v2258_v33 = vmul.f32 %v4669_v30, %v4669_v30 }
 0x949   : > { %v2263_v36 = vsel %vm1429_vm4, %v2258_v33, 0.0 }
 0x94a   : > { %2264 = vadd.xlane.f32.xlu1 %v2263_v36  ;;  %v3962_v36 = vld [vmem:[%s4314_s19 + $0x88] sm:$0xff]  }
 0x9d0   : > { %v2260_v1 = vpop.xlane.xlu1 %2259 }
 0x9d1   : > { %v2266_v55 = vmul.f32 0.0078125, %v2260_v1  ;;  %v2335_v1 = vrot.slane %v2330_v0, %v1518_v32 }
 0x9d2   : > { %v2262_v2 = vpop.xlane.xlu0 %2261 }
 0x9d3   : > { %v2269_v3 = vadd.f32 1e-06, %v2266_v55  ;;  %v2267_v5 = vmul.f32 0.0078125, %v2262_v2  ;;  %v2343_v55 = vrot.slane %v2330_v0, %v1526_v35  ;;  %v2339_v2 = vrot.slane %v2330_v0, %v1522_v34 }
 0x9d5   : > { %4017 = vrsqrt.f32 %v2269_v3  ;;  %v2270_v6 = vadd.f32 1e-06, %v2267_v5  ;;  %v2347_v3 = vrot.slane %v2330_v0, %v2346_v44 }
 0x9d7   : > { %4019 = vrsqrt.f32 %v2270_v6  ;;  %v2265_v7 = vpop.xlane.xlu1 %2264 }
 0x9d8   : > { %v2268_v8 = vmul.f32 0.0078125, %v2265_v7 }
 0x9da   : > { %v2271_v11 = vadd.f32 1e-06, %v2268_v8 }
 0x9dc   : > { %4021 = vrsqrt.f32 %v2271_v11 }
 0x9df   : > { %v4018_v12 = vpop.eup %4017 }
 0x9e0   : > { %v2275_v24 = vmul.f32 %v4018_v12, %v4659_v20  ;;  %v3958_v20 = vld [vmem:[%s4314_s19 + $0x80] sm:$0xff]  }
 0x9e1   : > { %v4020_v14 = vpop.eup %4019 }
 0x9e2   : > { %v2276_v15 = vmul.f32 %v4020_v14, %v4662_v22  ;;  %v2284_v16 = vmul.f32 %v3466_v13, %v2275_v24  ;;  %v3960_v22 = vld [vmem:[%s4314_s19 + $0xc8] sm:$0xff]  }
 0x9e4   : > { %v2285_v25 = vmul.f32 %v3466_v13, %v2276_v15  ;;  %v2293_v18 = vadd.f32 %v3467_v26, %v2284_v16 }
 0x9e6   : > { %v4022_v17 = vpop.eup %4021  ;;  %v2294_v19 = vadd.f32 %v3467_v26, %v2285_v25 }
 0x9e7   : > { %v2277_v21 = vmul.f32 %v4022_v17, %v4669_v30  ;;  %v3961_v30 = vld [vmem:[%s4314_s19 + $0x8] sm:$0xff]  }
 0x9e8   : > { %v2296_v23 = vpack.c.bf16 %v2294_v19, %v2293_v18 }
 0x9e9   : > { %v2286_v28 = vmul.f32 %v3466_v13, %v2277_v21 }
 0x9ea   : > { %2545 = vmatmul.mubr.bf16.vlgmr.msra.gmra.mrb[16].mxu1 %v2296_v23  ;;  %2596 = vmatmul.mubr.bf16.vlgmr.msra.gmra.mrb[16].mxu0 %v2296_v23 }
 0x9eb   : > { %2554 = vmatprep.mubr.bf16.mxu1 %v4095_v61  ;;  %2605 = vmatprep.mubr.bf16.mxu0 %v4095_v61  ;;  %v2295_v33 = vadd.f32 %v3467_v26, %v2286_v28  ;;  %v3964_v61 = vld [vmem:[%s4314_s19 + $0xd0] sm:$0xff]  }
 0x9ec   : > { %3631 = vmatpush3.bf16.msra.mxu1 %v3957_v27  ;;  %3659 = vmatpush3.bf16.msra.mxu0 %v3958_v20 }
 0x9ed   : > { %3632 = vmatprep.subr.bf16.mxu1 %v3959_v29  ;;  %3660 = vmatprep.subr.bf16.mxu0 %v3960_v22  ;;  %v2297_v37 = vpack.c.bf16 %v2295_v33, %v2295_v33 }
 0x9f0   : > { %3633 = vmatpush3.bf16.msra.mxu1 %v3961_v30  ;;  %3661 = vmatpush3.bf16.msra.mxu0 %v3962_v36 }
 0x9f1   : > { %3634 = vmatprep.subr.bf16.mxu1 %v3963_v38  ;;  %3662 = vmatprep.subr.bf16.mxu0 %v3964_v61 }
 0x9f2   : > { %2555 = vmatmul.mubr.bf16.gmra.mrb[20].mxu1 %v2297_v37  ;;  %2606 = vmatmul.mubr.bf16.gmra.mrb[20].mxu0 %v2297_v37 }
 0x9f4   : > { %3635 = vmatpush3.bf16.msra.mxu1 %v3965_v39  ;;  %3663 = vmatpush3.bf16.msra.mxu0 %v3966_v40 }
 0x9f5   : > { %3636 = vmatprep.subr.bf16.mxu1 %v3967_v43  ;;  %3664 = vmatprep.subr.bf16.mxu0 %v3968_v45 }
 0x9f8   : > { %3637 = vmatpush3.bf16.msra.mxu1 %v3969_v46  ;;  %3665 = vmatpush3.bf16.msra.mxu0 %v3970_v47 }
 0x9f9   : > { %3638 = vmatprep.subr.bf16.mxu1 %v3971_v48  ;;  %3666 = vmatprep.subr.bf16.mxu0 %v3972_v49 }
 0x9fc   : > { %3639 = vmatpush3.bf16.msra.mxu1 %v3973_v50  ;;  %3667 = vmatpush3.bf16.msra.mxu0 %v3974_v51 }
 0x9fd   : > { %3640 = vmatprep.subr.bf16.mxu1 %v3975_v52  ;;  %3668 = vmatprep.subr.bf16.mxu0 %v3976_v53 }
 0xa00   : > { %3641 = vmatpush3.bf16.msra.mxu1 %v3977_v54  ;;  %3669 = vmatpush3.bf16.msra.mxu0 %v3978_v56 }
 0xa01   : > { %3642 = vmatprep.subr.bf16.mxu1 %v3979_v57  ;;  %3670 = vmatprep.subr.bf16.mxu0 %v3980_v58 }
 0xa04   : > { %3643 = vmatpush3.bf16.msra.mxu1 %v3981_v59  ;;  %3671 = vmatpush3.bf16.msra.mxu0 %v3982_v60 }
 0xa05   : > { %3644 = vmatprep.subr.bf16.mxu1 %v3983_v62  ;;  %3672 = vmatprep.subr.bf16.mxu0 %v3984_v63 }
 0xa08   : > { %3645 = vmatpush3.bf16.msra.mxu1 %v3985_v41  ;;  %3673 = vmatpush3.bf16.msra.mxu0 %v3986_v42 }
 0xabd   : > { %v2546_v5 = vpop.f32.mrb[16].mxu1  ;;  %v2597_v6 = vpop.f32.mrb[16].mxu0 }
 0xabe   : > { %v2547_v7 = vadd.f32 %v2546_v5, %v2335_v1  ;;  %v2598_v8 = vadd.f32 %v2597_v6, %v2343_v55  ;;  %v2548_v11 = vpop.f32.mrb[17].mxu1  ;;  %v2599_v12 = vpop.f32.mrb[17].mxu0 }
 0xabf   : > { %v2549_v13 = vadd.f32 %v2548_v11, %v2339_v2  ;;  %v2600_v24 = vadd.f32 %v2599_v12, %v2347_v3  ;;  %v2550_v14 = vpop.f32.mrb[18].mxu1  ;;  %v2601_v15 = vpop.f32.mrb[18].mxu0 }
 0xac0   : > { %v2626_v16 = vmul.f32 0.70710677, %v2547_v7  ;;  %v2628_v26 = vmul.f32 0.70710677, %v2598_v8  ;;  %v2551_v35 = vadd.f32 %v2550_v14, %v2335_v1  ;;  %v2602_v17 = vadd.f32 %v2601_v15, %v2343_v55  ;;  %v2552_v31 = vpop.f32.mrb[19].mxu1  ;;  %v2603_v34 = vpop.f32.mrb[19].mxu0 }
 0xac1   : > { %v2627_v32 = vmul.f32 0.70710677, %v2549_v13  ;;  %v2629_v25 = vmul.f32 0.70710677, %v2600_v24  ;;  %v2553_v18 = vadd.f32 %v2552_v31, %v2339_v2  ;;  %v2604_v19 = vadd.f32 %v2603_v34, %v2347_v3 }
 0xac2   : > { %4023 = verf.f32 %v2626_v16  ;;  %v2630_v21 = vmul.f32 0.70710677, %v2551_v35  ;;  %v2632_v23 = vmul.f32 0.70710677, %v2602_v17  ;;  %v2614_v56 = vmul.f32 0.5, %v2547_v7 }
 0xac3   : > { %4025 = verf.f32 %v2628_v26  ;;  %v2631_v27 = vmul.f32 0.70710677, %v2553_v18  ;;  %v2633_v28 = vmul.f32 0.70710677, %v2604_v19  ;;  %v2616_v57 = vmul.f32 0.5, %v2598_v8 }
 0xac4   : > { %4027 = verf.f32 %v2627_v32  ;;  %v2615_v60 = vmul.f32 0.5, %v2549_v13  ;;  %v2618_v63 = vmul.f32 0.5, %v2551_v35  ;;  %v2617_v0 = vmul.f32 0.5, %v2600_v24 }
 0xac5   : > { %4029 = verf.f32 %v2629_v25  ;;  %v2556_v20 = vpop.f32.mrb[20].mxu1  ;;  %v2607_v22 = vpop.f32.mrb[20].mxu0  ;;  %v2619_v6 = vmul.f32 0.5, %v2553_v18  ;;  %v2621_v8 = vmul.f32 0.5, %v2604_v19 }
 0xac6   : > { %4031 = verf.f32 %v2630_v21  ;;  %v4753_v29 = vadd.f32 %v2556_v20, %v2335_v1  ;;  %v2558_v33 = vpop.f32.mrb[21].mxu1  ;;  %v4755_v30 = vadd.f32 %v2607_v22, %v2343_v55  ;;  %v2609_v37 = vpop.f32.mrb[21].mxu0  ;;  %v2620_v1 = vmul.f32 0.5, %v2602_v17 }
 0xac7   : > { %4033 = verf.f32 %v2632_v23  ;;  %v2559_v36 = vadd.f32 %v2558_v33, %v2339_v2  ;;  %v2560_v38 = vpop.f32.mrb[22].mxu1  ;;  %v2610_v39 = vadd.f32 %v2609_v37, %v2347_v3  ;;  %v2611_v40 = vpop.f32.mrb[22].mxu0 }
 0xac8   : > { %4035 = verf.f32 %v2631_v27  ;;  %v2634_v61 = vmul.f32 0.70710677, %v4753_v29  ;;  %v2561_v43 = vpop.f32.mrb[23].mxu1  ;;  %v2636_v45 = vmul.f32 0.70710677, %v4755_v30  ;;  %v2612_v46 = vpop.f32.mrb[23].mxu0 }
 0xac9   : > { %4037 = verf.f32 %v2633_v28  ;;  %v2635_v47 = vmul.f32 0.70710677, %v2559_v36  ;;  %v2637_v48 = vmul.f32 0.70710677, %v2610_v39  ;;  %v2623_v34 = vmul.f32 0.5, %v2559_v36 }
 0xaca   : > { %4039 = verf.f32 %v2634_v61  ;;  %v2625_v18 = vmul.f32 0.5, %v2610_v39  ;;  %v2622_v33 = vmul.f32 0.5, %v4753_v29  ;;  %v2624_v38 = vmul.f32 0.5, %v4755_v30 }
 0xacb   : > { %4041 = verf.f32 %v2636_v45 }
 0xacc   : > { %v4024_v49 = vpop.eup %4023  ;;  %4043 = verf.f32 %v2635_v47  ;;  %v3500_v47 = vld [vmem:[%s928_s8] ss:$0 sm:$0xff]  ;;  %s4886_s8 = sld [smem:[#allocation3_spill]] }
 0xacd   : > { %v4026_v50 = vpop.eup %4025  ;;  %4045 = verf.f32 %v2637_v48  ;;  %v2650_v53 = vadd.f32 1.0, %v4024_v49 }
 0xace   : > { %v4028_v51 = vpop.eup %4027  ;;  %v2652_v58 = vadd.f32 1.0, %v4026_v50 }
 0xacf   : > { %v4030_v52 = vpop.eup %4029  ;;  %v2651_v62 = vadd.f32 1.0, %v4028_v51  ;;  %v2662_v3 = vmul.f32 %v2650_v53, %v2614_v56 }
 0xad0   : > { %v4032_v54 = vpop.eup %4031  ;;  %v2653_v44 = vadd.f32 1.0, %v4030_v52  ;;  %v2664_v14 = vmul.f32 %v2652_v58, %v2616_v57  ;;  %v3533_v58 = vld [vmem:[%s931_s3] ss:$0 sm:$0xff] }
 0xad1   : > { %v4034_v59 = vpop.eup %4033  ;;  %v2654_v41 = vadd.f32 1.0, %v4032_v54  ;;  %v2663_v13 = vmul.f32 %v2651_v62, %v2615_v60 }
 0xad2   : > { %v4036_v42 = vpop.eup %4035  ;;  %v2656_v55 = vadd.f32 1.0, %v4034_v59  ;;  %v2665_v35 = vmul.f32 %v2653_v44, %v2617_v0  ;;  %p3534_p10 = scmp.lt.s32.totalorder %s4886_s8, 2 }
 0xad3   : > { %v4038_v2 = vpop.eup %4037  ;;  %v2666_v5 = vmul.f32 %v2654_v41, %v2618_v63  ;;  %v2655_v11 = vadd.f32 1.0, %v4036_v42  ;;  %s4887_s4 = sld [smem:[#allocation26_spill]] (!%p3534_p10)  ;;  %s4888_s23 = sld [smem:[#allocation27_spill]] (!%p3534_p10) }
 0xad4   : > { %v4040_v12 = vpop.eup %4039  ;;  %v2668_v7 = vmul.f32 %v2656_v55, %v2620_v1  ;;  %v2657_v15 = vadd.f32 1.0, %v4038_v2 }
 0xad5   : > { %v4042_v16 = vpop.eup %4041  ;;  %v2674_v26 = vpack.c.bf16 %v2666_v5, %v2662_v3  ;;  %v2667_v32 = vmul.f32 %v2655_v11, %v2619_v6  ;;  %v2658_v27 = vadd.f32 1.0, %v4040_v12 }
 0xad6   : > { %v4044_v25 = vpop.eup %4043  ;;  %v2676_v24 = vpack.c.bf16 %v2668_v7, %v2664_v14  ;;  %v2669_v31 = vmul.f32 %v2657_v15, %v2621_v8  ;;  %v2660_v22 = vadd.f32 1.0, %v4042_v16 }
 0xad7   : > { %v4046_v17 = vpop.eup %4045  ;;  %v2659_v21 = vadd.f32 1.0, %v4044_v25  ;;  %v2675_v23 = vpack.c.bf16 %v2667_v32, %v2663_v13  ;;  %v2670_v40 = vmul.f32 %v2658_v27, %v2622_v33 }
 0xad8   : > { %v2661_v20 = vadd.f32 1.0, %v4046_v17  ;;  %v2677_v28 = vpack.c.bf16 %v2669_v31, %v2665_v35  ;;  %v2672_v43 = vmul.f32 %v2660_v22, %v2624_v38 }
 0xad9   : > { %2977 = vmatprep.mubr.bf16.mxu1 %v2675_v23  ;;  %v2671_v19 = vmul.f32 %v2659_v21, %v2623_v34  ;;  %v2678_v39 = vpack.c.bf16 %v2670_v40, %v2670_v40  ;;  %v3535_v40 = vld [vmem:[%s4887_s4] ss:$0 sm:$0xff] (!%p3534_p10) }
 0xada   : > { %3025 = vmatprep.mubr.bf16.mxu0 %v2677_v28  ;;  %2978 = vmatmul.mubr.bf16.vlgmr.msra.gmra.mrb[24].mxu1 %v2674_v26  ;;  %v2673_v37 = vmul.f32 %v2661_v20, %v2625_v18  ;;  %v2680_v45 = vpack.c.bf16 %v2672_v43, %v2672_v43 }
 0xadb   : > { %3026 = vmatmul.mubr.bf16.vlgmr.msra.gmra.mrb[24].mxu0 %v2676_v24  ;;  %v2679_v61 = vpack.c.bf16 %v2671_v19, %v2671_v19 }
 0xadc   : > { %v2681_v36 = vpack.c.bf16 %v2673_v37, %v2673_v37 }
 0xadd   : > { %2985 = vmatprep.mubr.bf16.mxu1 %v2679_v61 }
 0xade   : > { %3033 = vmatprep.mubr.bf16.mxu0 %v2681_v36 }
 0xae2   : > { %2986 = vmatmul.mubr.bf16.gmra.mrb[28].mxu1 %v2678_v39  ;;  %v3536_v39 = vld [vmem:[%s4888_s23] ss:$0 sm:$0xff] (!%p3534_p10) }
 0xae3   : > { %3034 = vmatmul.mubr.bf16.gmra.mrb[28].mxu0 %v2680_v45 }
 0xbad   : > { %v3646_v46 = vpop.f32.mrb[24].mxu1 }
 0xbae   : > { %v3674_v29 = vpop.f32.mrb[24].mxu0  ;;  %v3647_v30 = vpop.f32.mrb[25].mxu1 }
 0xbaf   : > { %v3648_v48 = vadd.f32 %v3647_v30, %v3646_v46  ;;  %v3675_v49 = vpop.f32.mrb[25].mxu0  ;;  %v3649_v50 = vpop.f32.mrb[26].mxu1 }
 0xbb0   : > { %v3676_v51 = vadd.f32 %v3675_v49, %v3674_v29  ;;  %v3677_v52 = vpop.f32.mrb[26].mxu0  ;;  %v3650_v53 = vpop.f32.mrb[27].mxu1 }
 0xbb1   : > { %v2980_v54 = vadd.f32 %v3648_v48, %v3500_v47  ;;  %v3651_v56 = vadd.f32 %v3650_v53, %v3649_v50  ;;  %v3678_v57 = vpop.f32.mrb[27].mxu0 }
 0xbb2   : > { %v3679_v59 = vadd.f32 %v3678_v57, %v3677_v52 }
 0xbb3   : > { %v3028_v60 = vadd.f32 %v3676_v51, %v2980_v54  ;;  %v2983_v62 = vadd.f32 %v3651_v56, %v3500_v47 }
 0xbb5   : > { %v3048_v63 = vmul.f32 %v3533_v58, %v3028_v60  ;;  %v3031_v41 = vadd.f32 %v3679_v59, %v2983_v62  ;;  %v3652_v42 = vpop.f32.mrb[28].mxu1 }
 0xbb6   : > { %v3680_v0 = vpop.f32.mrb[28].mxu0  ;;  %v3653_v44 = vpop.f32.mrb[29].mxu1 }
 0xbb7   : > { %v3051_v1 = vadd.f32 %v3048_v63, %v4638_v4  ;;  %v3049_v55 = vmul.f32 %v3533_v58, %v3031_v41  ;;  %v3654_v2 = vadd.f32 %v3653_v44, %v3652_v42  ;;  %v3681_v3 = vpop.f32.mrb[29].mxu0  ;;  %v3655_v5 = vpop.f32.mrb[30].mxu1 }
 0xbb8   : > { %v3682_v6 = vadd.f32 %v3681_v3, %v3680_v0  ;;  %v3683_v11 = vpop.f32.mrb[30].mxu0  ;;  %v3656_v12 = vpop.f32.mrb[31].mxu1 }
 0xbb9   : > { %3054 = vst [vmem:[#allocation2] sm:$0xff] %v3051_v1  ;;  %v3052_v14 = vadd.f32 %v3049_v55, %v4642_v9  ;;  %v2988_v7 = vadd.f32 %v3654_v2, %v3500_v47  ;;  %v3684_v8 = vpop.f32.mrb[31].mxu0 }
 0xbbb   : > { %3055 = vst [vmem:[#allocation2 + $0x8] sm:$0xff] %v3052_v14  ;;  %v3036_v15 = vadd.f32 %v3682_v6, %v2988_v7  ;;  %3060 = sbr.rel (%p3534_p10) target bundleno = 3330 (0xd02), region = 116  ;;  %3065 = vadd.xlane.f32.xlu1 (!%p3534_p10), %v3052_v14 }
 0xbbd   : > { %v3050_v16 = vmul.f32 %v3533_v58, %v3036_v15 }
 0xbbf   : > { %v3053_v13 = vadd.f32 %v3050_v16, %v4645_v10 }
 0xbc1   : > { %3056 = vst [vmem:[#allocation2 + $0x10] sm:$0x1] %v3053_v13  ;;  %v3067_v4 = vsel (!%p3534_p10), %vm1429_vm4, %v3053_v13, 0.0 }
 0xbc2   : > { %3068 = vadd.xlane.f32.xlu0 %v3067_v4 }
 0xbc6   : > { %3063 = vadd.xlane.f32.xlu0 %v3051_v1 }
 0xc48   : > { %v3066_v26 = vpop.xlane.xlu1 %3065 }
 0xc49   : > { %v3071_v32 = vmul.f32 0.0078125, %v3066_v26 }
 0xc4b   : > { %v3074_v9 = vsub.f32 %v3052_v14, %v3071_v32 }
 0xc4d   : > { %v3077_v31 = vmul.f32 %v3074_v9, %v3074_v9 }
 0xc4f   : > { %v3069_v25 = vpop.xlane.xlu0 %3068  ;;  %3081 = vadd.xlane.f32.xlu0 %v3077_v31 }
 0xc50   : > { %v3072_v35 = vmul.f32 0.0078125, %v3069_v25 }
 0xc52   : > { %v3075_v34 = vsub.f32 %v3053_v13, %v3072_v35 }
 0xc53   : > { %v3064_v24 = vpop.xlane.xlu0 %3063 }
 0xc54   : > { %v3070_v17 = vmul.f32 0.0078125, %v3064_v24  ;;  %v3078_v23 = vmul.f32 %v3075_v34, %v3075_v34 }
 0xc56   : > { %v3073_v10 = vsub.f32 %v3051_v1, %v3070_v17  ;;  %v3083_v27 = vsel %vm1429_vm4, %v3078_v23, 0.0 }
 0xc58   : > { %v3076_v21 = vmul.f32 %v3073_v10, %v3073_v10 }
 0xc5a   : > { %3079 = vadd.xlane.f32.xlu1 %v3076_v21 }
 0xc5e   : > { %3084 = vadd.xlane.f32.xlu1 %v3083_v27 }
 0xcdc   : > { %v3082_v18 = vpop.xlane.xlu0 %3081 }
 0xcdd   : > { %v3087_v20 = vmul.f32 0.0078125, %v3082_v18 }
 0xcdf   : > { %v3090_v28 = vadd.f32 1e-06, %v3087_v20 }
 0xce1   : > { %4047 = vrsqrt.f32 %v3090_v28 }
 0xce7   : > { %v3080_v22 = vpop.xlane.xlu1 %3079 }
 0xce8   : > { %v3086_v19 = vmul.f32 0.0078125, %v3080_v22 }
 0xcea   : > { %v3089_v33 = vadd.f32 1e-06, %v3086_v19 }
 0xceb   : > { %v3085_v37 = vpop.xlane.xlu1 %3084  ;;  %v4048_v36 = vpop.eup %4047 }
 0xcec   : > { %4049 = vrsqrt.f32 %v3089_v33  ;;  %v3088_v38 = vmul.f32 0.0078125, %v3085_v37  ;;  %v3096_v43 = vmul.f32 %v4048_v36, %v3074_v9 }
 0xcee   : > { %v3091_v61 = vadd.f32 1e-06, %v3088_v38  ;;  %v3105_v45 = vmul.f32 %v3535_v40, %v3096_v43 }
 0xcf0   : > { %4051 = vrsqrt.f32 %v3091_v61  ;;  %v3114_v29 = vadd.f32 %v3536_v39, %v3105_v45 }
 0xcf2   : > { %3117 = vst [vmem:[%s4329_s2 + $0x8] sm:$0xff] %v3114_v29 }
 0xcf6   : > { %v4050_v46 = vpop.eup %4049 }
 0xcf7   : > { %v3095_v47 = vmul.f32 %v4050_v46, %v3073_v10 }
 0xcf9   : > { %v3104_v30 = vmul.f32 %v3535_v40, %v3095_v47 }
 0xcfa   : > { %v4052_v48 = vpop.eup %4051 }
 0xcfb   : > { %v3113_v49 = vadd.f32 %v3536_v39, %v3104_v30  ;;  %v3097_v50 = vmul.f32 %v4052_v48, %v3075_v34 }
 0xcfd   : > { %3116 = vst [vmem:[%s4329_s2] sm:$0xff] %v3113_v49  ;;  %v3106_v51 = vmul.f32 %v3535_v40, %v3097_v50 }
 0xcff   : > { %v3115_v52 = vadd.f32 %v3536_v39, %v3106_v51 }
 0xd01   : > { %3118 = vst [vmem:[%s4329_s2 + $0x10] sm:$0x1] %v3115_v52 }
 0xd02 PF: > { %s4889_s24 = sld [smem:[#allocation6_spill]]  ;;  %s4890_s3 = sld [smem:[#allocation4_spill]] }
 0xd03   : > { %s4891_s28 = sld [smem:[#allocation5_spill]]  ;;  %s4892_s29 = sld [smem:[#allocation7_spill]] }
 0xd04   : > { %s4893_s30 = sld [smem:[#allocation8_spill]] }
 0xd08   : > { %s32_s4 = sadd.s32 1, %s4889_s24  }
 0xd09   : > { %p29_p11 = scmp.ge.s32.totalorder %s32_s4, 14  }
 0xd0b   :  { %31 = sbr.rel (!%p29_p11) target bundleno = 21 (0x15), region = 188 }

</bundles_post_ra>
